<compile_context>
chip_gen: v5e
topology: v5e:2x2
jax: 0.10.0
libtpu: 0.0.40
codegen_flags: <defaults>
</compile_context>

<pallas_src>
import jax
import jax.numpy as jnp
from jax import lax
from jax.experimental import pallas as pl
from jax.experimental.pallas import tpu as pltpu

# Small, shape-consistent hyper-parameters for the synthetic test.
MODEL_DIM = 32         # model_dim
NUM_LAYERS = 2         # num_layers
HEAD_DIM = 16          # attn_head_dim (also the rotary dim)
NUM_HEADS = 4          # attn_num_heads
FF_MULT = 4            # ff_mult
FF_DIM = MODEL_DIM * FF_MULT
BATCH = 2
SEQ = 16

NEG_BIG = -1e30        # finite additive mask value (safer than -f32.max)
HI = jax.lax.Precision.HIGHEST  # reference only


def _gelu(v):
    # TODO(synk): PyTorch nn.GELU() defaults to the exact erf formulation; erf is not
    # guaranteed to lower in Mosaic, so both kernel and reference use the tanh approx.
    c = 0.7978845608028654  # sqrt(2/pi)
    return 0.5 * v * (1.0 + jnp.tanh(c * (v + 0.044715 * v * v * v)))


# --------------------------------------------------------------------------
# Pallas kernel: whole decoder forward for one (SEQ, D) sequence per grid step.
# --------------------------------------------------------------------------
def decoder_kernel(x_ref, cs_ref, wqkv_ref, wo_ref, w1_ref, b1_ref, w2_ref,
                   dvec_ref, o_ref):
    seq, d = x_ref.shape            # (SEQ, MODEL_DIM)
    dh, nh = HEAD_DIM, NUM_HEADS
    f32, bf16 = jnp.float32, jnp.bfloat16

    x = x_ref[...]                  # (S, D) f32
    cs = cs_ref[...]                # (2, S, 128) rotary combine tables [cos-like, sin-like]
    cmul, smul = cs[0], cs[1]
    b1_all = b1_ref[...]            # (L, FF)
    dv = dvec_ref[...]              # (L+1, D): rows 0..L-1 = b2, row L = out-norm gamma

    # ---- constants hoisted out of the (unrolled) layer loop -----------------
    lane = lax.broadcasted_iota(jnp.int32, (seq, d), 1)
    row = lax.broadcasted_iota(jnp.int32, (seq, d), 0)
    keep_first_half = lane < (d // 2)        # token_shift passes the first half through
    not_first_row = row > 0                  # zero the shifted half at t == 0
    # causal mask for head-stacked (H*S, S) scores; query position = row % S
    r = lax.broadcasted_iota(jnp.int32, (nh * seq, seq), 0)
    c = lax.broadcasted_iota(jnp.int32, (nh * seq, seq), 1)
    causal = c <= (r % seq)

    def token_shift(v):
        # second half of channels shifted down one token; exact XLU sublane rotate
        shifted = pltpu.roll(v, shift=1, axis=0)
        shifted = jnp.where(not_first_row, shifted, 0.0)
        return jnp.where(keep_first_half, v, shifted)

    def rms_nogamma(v):  # gammas are folded into the following projection weights
        ss = jnp.sum(v * v, axis=-1, keepdims=True)
        return v * (lax.rsqrt(jnp.maximum(ss, 1e-24)) * float(d) ** 0.5)

    nt_dims = (((1,), (1,)), ((), ()))       # A @ B.T without materializing B.T

    # Static unroll over layers (fine at depth 2).
    # TODO(synk): at production depth switch to a layer grid axis with per-layer weight
    # BlockSpecs (streams weights through VMEM; required for v7x's 64 MiB VMEM).
    for l in range(NUM_LAYERS):
        # ---------------- attention block ------------------------------------
        xn = rms_nogamma(token_shift(x))
        # One fused 2D MQA projection (bf16 MXU, f32 accumulate):
        #   cols [ q heads (H*dh) | k (dh) | v (dh) | 0 ][ q@R | k@R | 0 | 0 ]
        qkv = jnp.dot(xn.astype(bf16), wqkv_ref[l],
                      preferred_element_type=f32)               # (S, 256)
        # Whole-vreg rotary: split at the 128-lane vreg boundary, combine with the
        # pre-tiled cos/sin tables (v columns get cos=1 / sin=0, pads are zero weight).
        rot = qkv[:, :128] * cmul + qkv[:, 128:] * smul         # (S,128)=[q_rot|k_rot|v|0]
        k = rot[:, nh * dh:nh * dh + dh]                        # (S, dh) shared MQA key
        v = rot[:, nh * dh + dh:nh * dh + 2 * dh]               # (S, dh) shared MQA value
        # Stack heads along sublanes -> one 2D scores matmul and one 2D P@V matmul.
        q = jnp.concatenate(
            [rot[:, i * dh:(i + 1) * dh] for i in range(nh)], axis=0)    # (H*S, dh)
        s = lax.dot_general(q.astype(bf16), k.astype(bf16), nt_dims,
                            preferred_element_type=f32)         # (H*S, S)
        s = jnp.where(causal, s, NEG_BIG)
        s = s - jnp.max(s, axis=-1, keepdims=True)
        e = jnp.exp(s)
        p = e * pl.reciprocal(jnp.sum(e, axis=-1, keepdims=True), approx=True)
        ao = jnp.dot(p.astype(bf16), v.astype(bf16),
                     preferred_element_type=f32)                # (H*S, dh)
        # Regroup heads onto lanes; the head axis is contracted on the MXU by wo.
        ao = jnp.concatenate(
            [ao[i * seq:(i + 1) * seq, :] for i in range(nh)], axis=-1)  # (S, H*dh)
        x = jnp.dot(ao.astype(bf16), wo_ref[l],
                    preferred_element_type=f32) + x
        # ---------------- feed-forward block ----------------------------------
        xn = rms_nogamma(token_shift(x))
        hdn = jnp.dot(xn.astype(bf16), w1_ref[l],
                      preferred_element_type=f32) + b1_all[l:l + 1]
        hdn = _gelu(hdn)
        x = jnp.dot(hdn.astype(bf16), w2_ref[l],
                    preferred_element_type=f32) + dv[l:l + 1] + x

    # final RMSNorm (gamma = last row of dv)
    ss = jnp.sum(x * x, axis=-1, keepdims=True)
    # TODO(synk): D=32 < 128 lanes so this store is lane-masked; a lane-dense (8,128)
    # output slab would need an in-kernel relayout-reshape that costs more than the
    # single 4 KB masked store at these toy shapes.
    o_ref[...] = (x * (lax.rsqrt(jnp.maximum(ss, 1e-24)) * float(d) ** 0.5)
                  * dv[NUM_LAYERS:NUM_LAYERS + 1])


def _full_block(a):
    nd = a.ndim
    return pl.BlockSpec(a.shape, lambda i, _nd=nd: (0,) * _nd)


def transformer_decoder(x, params):
    """Decoder forward. x: (B, SEQ, D) float32, params as produced by init_params."""
    b, n, d = x.shape
    (cos, sin, g_attn, wq, wkv, wo, g_ff, w1, b1, w2, b2, g_out) = params
    num_layers = wq.shape[0]
    nh, dh = NUM_HEADS, HEAD_DIM
    scale = dh ** -0.5
    half = dh // 2
    f32, bf16 = jnp.float32, jnp.bfloat16

    # rotate_half(x) == x @ rot, with rot = [[0, I], [-I, 0]]  (exact ±1 matrix).
    eye = jnp.eye(half, dtype=f32)
    zer = jnp.zeros((half, half), f32)
    rot = jnp.concatenate(
        [jnp.concatenate([zer, eye], axis=1),
         jnp.concatenate([-eye, zer], axis=1)], axis=0)               # (dh, dh)

    # Fold pre-norm gamma + 1/sqrt(dh) into the projections and build ONE fused 2D
    # MQA weight per layer (shared k/v stored once, not per head):
    #   left  128 cols: [ q heads (H*dh) | k (dh) | v (dh) | 0 pad (2*dh) ]
    #   right 128 cols: [ q@R heads      | k@R    | 0      | 0 pad        ]
    ga = g_attn[:, :, None]                                           # (L, D, 1)
    wqg = wq * ga * scale                                             # (L, D, H*dh)
    wqgr = jnp.einsum('ldhe,ef->ldhf',
                      wqg.reshape(num_layers, d, nh, dh),
                      rot).reshape(num_layers, d, nh * dh)
    wkg = wkv[:, :, :dh] * ga                                         # (L, D, dh)
    wkgr = jnp.einsum('lde,ef->ldf', wkg, rot)
    wvg = wkv[:, :, dh:] * ga
    zpad1 = jnp.zeros((num_layers, d, dh), f32)
    zpad2 = jnp.zeros((num_layers, d, 2 * dh), f32)
    wqkv_f = jnp.concatenate(
        [wqg, wkg, wvg, zpad2, wqgr, wkgr, zpad1, zpad2],
        axis=-1).astype(bf16)                                          # (L, D, 256)

    # Rotary combine tables matching the fused-weight column layout (128 lanes wide,
    # so the in-kernel combine is whole-vreg VPU math; v/pad columns: cos=1, sin=0).
    cmul = jnp.concatenate(
        [jnp.tile(cos, (1, nh)), cos, jnp.ones((n, 3 * dh), f32)], axis=-1)   # (n, 128)
    smul = jnp.concatenate(
        [jnp.tile(sin, (1, nh)), sin, jnp.zeros((n, 3 * dh), f32)], axis=-1)  # (n, 128)
    cs = jnp.stack([cmul, smul])                                       # (2, n, 128)

    w1f = (w1 * g_ff[:, :, None]).astype(bf16)                         # (L, D, FF)
    wo_bf = wo.astype(bf16)                                            # (L, H*dh, D)
    w2_bf = w2.astype(bf16)                                            # (L, FF, D)
    dvecs = jnp.concatenate([b2, g_out[None, :]], axis=0)              # (L+1, D) f32

    xf = x.reshape(b * n, d).astype(f32)
    inputs = (xf, cs, wqkv_f, wo_bf, w1f, b1, w2_bf, dvecs)

    out = pl.pallas_call(
        decoder_kernel,
        out_shape=jax.ShapeDtypeStruct((b * n, d), f32),
        grid_spec=pltpu.PrefetchScalarGridSpec(
            num_scalar_prefetch=0,
            # One sequence per grid step, "parallel": v7x's two TensorCores each take
            # a batch element; on single-TC v5e/v6e it is a near-free sequential loop.
            grid=(b,),
            in_specs=[pl.BlockSpec((n, d), lambda i: (i, 0))]
                     + [_full_block(a) for a in inputs[1:]],
            out_specs=pl.BlockSpec((n, d), lambda i: (i, 0)),
        ),
        # TODO(synk): at production sizes also set vmem_limit_bytes and move to a
        # flash-style sequence-block grid; unnecessary at these toy shapes.
        compiler_params=pltpu.CompilerParams(
            dimension_semantics=("parallel",)),
    )(*inputs)
    return out.reshape(b, n, d)


# --------------------------------------------------------------------------
# Deterministic parameter init (shapes dictated by the module's __init__).
# --------------------------------------------------------------------------
def init_params(key):
    inner = NUM_HEADS * HEAD_DIM
    ks = jax.random.split(key, 10)

    def lin(k, shape, fan_in):  # PyTorch nn.Linear-style uniform init
        bound = 1.0 / (fan_in ** 0.5)
        return jax.random.uniform(k, shape, jnp.float32, -bound, bound)

    wq = lin(ks[0], (NUM_LAYERS, MODEL_DIM, inner), MODEL_DIM)
    wkv = lin(ks[1], (NUM_LAYERS, MODEL_DIM, 2 * HEAD_DIM), MODEL_DIM)
    wo = lin(ks[2], (NUM_LAYERS, inner, MODEL_DIM), inner)
    w1 = lin(ks[3], (NUM_LAYERS, MODEL_DIM, FF_DIM), MODEL_DIM)
    b1 = lin(ks[4], (NUM_LAYERS, FF_DIM), MODEL_DIM)
    w2 = lin(ks[5], (NUM_LAYERS, FF_DIM, MODEL_DIM), FF_DIM)
    b2 = lin(ks[6], (NUM_LAYERS, MODEL_DIM), FF_DIM)
    # RMSNorm gains (ones in torch init; randomized here to exercise gamma folding).
    g_attn = jax.random.uniform(ks[7], (NUM_LAYERS, MODEL_DIM), jnp.float32, 0.5, 1.5)
    g_ff = jax.random.uniform(ks[8], (NUM_LAYERS, MODEL_DIM), jnp.float32, 0.5, 1.5)
    g_out = jax.random.uniform(ks[9], (MODEL_DIM,), jnp.float32, 0.5, 1.5)

    # Rotary embedding table: freqs = cat(outer(t, inv_freq), outer(t, inv_freq))
    inv_freq = 1.0 / (10000.0 ** (jnp.arange(0, HEAD_DIM, 2,
                                              dtype=jnp.float32) / HEAD_DIM))
    t = jnp.arange(SEQ, dtype=jnp.float32)
    half_freqs = t[:, None] * inv_freq[None, :]
    freqs = jnp.concatenate([half_freqs, half_freqs], axis=-1)        # (SEQ, dh)
    return (jnp.cos(freqs), jnp.sin(freqs), g_attn, wq, wkv, wo,
            g_ff, w1, b1, w2, b2, g_out)


# --------------------------------------------------------------------------
# Plain-JAX reference (structured like the PyTorch module, f32 HIGHEST).
# --------------------------------------------------------------------------
def reference(x, params):
    cos, sin, g_attn, wq, wkv, wo, g_ff, w1, b1, w2, b2, g_out = params
    dh = HEAD_DIM
    scale = dh ** -0.5

    def token_shift(v):
        half = v.shape[-1] // 2
        shifted = jnp.concatenate(
            [jnp.zeros((1, half), v.dtype), v[:-1, half:]], axis=0)
        return jnp.concatenate([v[:, :half], shifted], axis=-1)

    def rmsnorm(v, g):
        d = v.shape[-1]
        nrm = jnp.sqrt(jnp.sum(v * v, axis=-1, keepdims=True))
        return v / jnp.maximum(nrm, 1e-12) * (d ** 0.5) * g

    def rotate_half(v):
        hh = v.shape[-1] // 2
        return jnp.concatenate([-v[:, hh:], v[:, :hh]], axis=-1)

    def rope(v):
        return v * cos + rotate_half(v) * sin

    def attn(xb, l):
        nseq = xb.shape[0]
        xs = rmsnorm(token_shift(xb), g_attn[l])
        q = jnp.dot(xs, wq[l], precision=HI)
        kv = jnp.dot(xs, wkv[l], precision=HI)
        k = rope(kv[:, :dh])
        v = kv[:, dh:]
        row = lax.broadcasted_iota(jnp.int32, (nseq, nseq), 0)
        col = lax.broadcasted_iota(jnp.int32, (nseq, nseq), 1)
        causal = col <= row
        outs = []
        for hh in range(NUM_HEADS):
            qh = rope(q[:, hh * dh:(hh + 1) * dh])
            sim = jnp.dot(qh, k.T, precision=HI) * scale
            sim = jnp.where(causal, sim, NEG_BIG)
            sim = sim - jnp.max(sim, axis=-1, keepdims=True)
            w = jnp.exp(sim)
            w = w / jnp.sum(w, axis=-1, keepdims=True)
            outs.append(jnp.dot(w, v, precision=HI))
        o = jnp.dot(jnp.concatenate(outs, axis=-1), wo[l], precision=HI)
        return o + xb

    def ff(xb, l):
        xs = rmsnorm(token_shift(xb), g_ff[l])
        hdn = _gelu(jnp.dot(xs, w1[l], precision=HI) + b1[l])
        return jnp.dot(hdn, w2[l], precision=HI) + b2[l] + xb

    def single(xb):
        y = xb
        for l in range(NUM_LAYERS):
            y = ff(attn(y, l), l)
        return rmsnorm(y, g_out)

    return jax.vmap(single)(x)


if __name__ == "__main__":
    key = jax.random.PRNGKey(0)
    kx, kp = jax.random.split(key)
    x = jax.random.normal(kx, (BATCH, SEQ, MODEL_DIM), jnp.float32)
    params = init_params(kp)

    out = jax.block_until_ready(transformer_decoder(x, params))
    ref = reference(x, params)

    assert out.shape == (BATCH, SEQ, MODEL_DIM)
    # Tolerance re-derived for the new precision setup: MXU operands are bf16
    # (~2^-9 relative rounding per operand) through ~8 chained matmuls per token,
    # plus the EUP approximate reciprocal (softmax) and rsqrt (RMSNorm).  The old
    # all-f32 version already measured 2.1e-3 max abs error from the EUP approximations
    # alone; the bf16 operand path adds ~1e-2 worst case, so 5e-2 leaves comfortable
    # margin while still catching any real semantic bug (those show up as O(1) errors).
    max_err = float(jnp.max(jnp.abs(out - ref)))
    assert max_err < 5e-2, f"mismatch vs JAX reference: {max_err}"

    print("KERNEL_OK")
</pallas_src>

<mosaic_0001>
module attributes {stable_mosaic.version = 11 : i64} {
  func.func @decoder_kernel(%arg0: i32, %arg1: memref<16x32xf32, #tpu.memory_space<vmem>>, %arg2: memref<2x16x128xf32, #tpu.memory_space<vmem>>, %arg3: memref<2x32x256xbf16, #tpu.memory_space<vmem>>, %arg4: memref<2x64x32xbf16, #tpu.memory_space<vmem>>, %arg5: memref<2x32x128xbf16, #tpu.memory_space<vmem>>, %arg6: memref<2x128xf32, #tpu.memory_space<vmem>>, %arg7: memref<2x128x32xbf16, #tpu.memory_space<vmem>>, %arg8: memref<3x32xf32, #tpu.memory_space<vmem>>, %arg9: memref<16x32xf32, #tpu.memory_space<vmem>>) attributes {dimension_semantics = [#tpu.dimension_semantics<parallel>], iteration_bounds = array<i64: 2>, scalar_prefetch = 0 : i64, scratch_operands = 0 : i64, tpu.core_type = #tpu.core_type<tc>, window_params = [{transform_indices = @transform_0, window_bounds = array<i64: 16, 32>}, {pipeline_mode = #tpu.pipeline_mode<synchronous>, transform_indices = @transform_1, window_bounds = array<i64: 2, 16, 128>}, {pipeline_mode = #tpu.pipeline_mode<synchronous>, transform_indices = @transform_2, window_bounds = array<i64: 2, 32, 256>}, {pipeline_mode = #tpu.pipeline_mode<synchronous>, transform_indices = @transform_3, window_bounds = array<i64: 2, 64, 32>}, {pipeline_mode = #tpu.pipeline_mode<synchronous>, transform_indices = @transform_4, window_bounds = array<i64: 2, 32, 128>}, {pipeline_mode = #tpu.pipeline_mode<synchronous>, transform_indices = @transform_5, window_bounds = array<i64: 2, 128>}, {pipeline_mode = #tpu.pipeline_mode<synchronous>, transform_indices = @transform_6, window_bounds = array<i64: 2, 128, 32>}, {pipeline_mode = #tpu.pipeline_mode<synchronous>, transform_indices = @transform_7, window_bounds = array<i64: 3, 32>}, {transform_indices = @transform_8, window_bounds = array<i64: 16, 32>}]} {
    %c0 = arith.constant 0 : index
    %c0_0 = arith.constant 0 : index
    %0 = vector.load %arg1[%c0, %c0_0] : memref<16x32xf32, #tpu.memory_space<vmem>>, vector<16x32xf32>
    %c0_1 = arith.constant 0 : index
    %c0_2 = arith.constant 0 : index
    %c0_3 = arith.constant 0 : index
    %1 = vector.load %arg2[%c0_1, %c0_2, %c0_3] : memref<2x16x128xf32, #tpu.memory_space<vmem>>, vector<2x16x128xf32>
    %2 = vector.extract_strided_slice %1 {offsets = [0, 0, 0], sizes = [1, 16, 128], strides = [1, 1, 1]} : vector<2x16x128xf32> to vector<1x16x128xf32>
    %3 = vector.shape_cast %2 : vector<1x16x128xf32> to vector<16x128xf32>
    %4 = vector.extract_strided_slice %1 {offsets = [1, 0, 0], sizes = [1, 16, 128], strides = [1, 1, 1]} : vector<2x16x128xf32> to vector<1x16x128xf32>
    %5 = vector.shape_cast %4 : vector<1x16x128xf32> to vector<16x128xf32>
    %c0_4 = arith.constant 0 : index
    %c0_5 = arith.constant 0 : index
    %6 = vector.load %arg6[%c0_4, %c0_5] : memref<2x128xf32, #tpu.memory_space<vmem>>, vector<2x128xf32>
    %c0_6 = arith.constant 0 : index
    %c0_7 = arith.constant 0 : index
    %7 = vector.load %arg8[%c0_6, %c0_7] : memref<3x32xf32, #tpu.memory_space<vmem>>, vector<3x32xf32>
    %8 = tpu.iota {dimensions = array<i32: 1>} : vector<16x32xi32>
    %9 = tpu.iota {dimensions = array<i32: 0>} : vector<16x32xi32>
    %c16_i32 = arith.constant 16 : i32
    %10 = vector.broadcast %c16_i32 : i32 to vector<16x32xi32>
    %11 = arith.cmpi slt, %8, %10 : vector<16x32xi32>
    %c0_i32 = arith.constant 0 : i32
    %12 = vector.broadcast %c0_i32 : i32 to vector<16x32xi32>
    %13 = arith.cmpi sgt, %9, %12 : vector<16x32xi32>
    %14 = tpu.iota {dimensions = array<i32: 0>} : vector<64x16xi32>
    %15 = tpu.iota {dimensions = array<i32: 1>} : vector<64x16xi32>
    %c16_i32_8 = arith.constant 16 : i32
    %c0_i32_9 = arith.constant 0 : i32
    %16 = arith.cmpi eq, %c16_i32_8, %c0_i32_9 : i32
    %c1_i32 = arith.constant 1 : i32
    %17 = arith.select %16, %c1_i32, %c16_i32_8 : i32
    %18 = vector.broadcast %17 : i32 to vector<64x16xi32>
    %19 = arith.remsi %14, %18 : vector<64x16xi32>
    %c0_i32_10 = arith.constant 0 : i32
    %20 = vector.broadcast %c0_i32_10 : i32 to vector<64x16xi32>
    %21 = arith.cmpi ne, %19, %20 : vector<64x16xi32>
    %c0_i32_11 = arith.constant 0 : i32
    %22 = vector.broadcast %c0_i32_11 : i32 to vector<64x16xi32>
    %23 = arith.cmpi slt, %19, %22 : vector<64x16xi32>
    %c0_i32_12 = arith.constant 0 : i32
    %24 = arith.cmpi slt, %17, %c0_i32_12 : i32
    %25 = vector.broadcast %24 : i1 to vector<64x16xi1>
    %26 = vector.broadcast %25 : vector<64x16xi1> to vector<64x16xi1>
    %27 = arith.xori %23, %26 : vector<64x16xi1>
    %28 = arith.andi %27, %21 : vector<64x16xi1>
    %29 = vector.broadcast %17 : i32 to vector<64x16xi32>
    %30 = arith.addi %19, %29 : vector<64x16xi32>
    %31 = arith.select %28, %30, %19 : vector<64x16xi1>, vector<64x16xi32>
    %32 = arith.cmpi sle, %15, %31 : vector<64x16xi32>
    %c1_i32_13 = arith.constant 1 : i32
    %33 = tpu.dynamic_rotate %0 by %c1_i32_13 dim 0 : vector<16x32xf32>, i32 -> vector<16x32xf32>
    %cst = arith.constant 0.000000e+00 : f32
    %34 = vector.broadcast %cst : f32 to vector<16x32xf32>
    %35 = arith.select %13, %33, %34 : vector<16x32xi1>, vector<16x32xf32>
    %36 = arith.select %11, %0, %35 : vector<16x32xi1>, vector<16x32xf32>
    %37 = arith.mulf %36, %36 : vector<16x32xf32>
    %cst_14 = arith.constant dense<0.000000e+00> : vector<16xf32>
    %38 = vector.multi_reduction <add>, %37, %cst_14 [1] : vector<16x32xf32> to vector<16xf32>
    %39 = vector.shape_cast %38 : vector<16xf32> to vector<16x1xf32>
    %cst_15 = arith.constant 1.000000e-24 : f32
    %40 = vector.broadcast %cst_15 : f32 to vector<16x1xf32>
    %41 = arith.maximumf %39, %40 : vector<16x1xf32>
    %42 = math.rsqrt %41 : vector<16x1xf32>
    %cst_16 = arith.constant 5.65685415 : f32
    %43 = vector.broadcast %cst_16 : f32 to vector<16x1xf32>
    %44 = arith.mulf %42, %43 : vector<16x1xf32>
    %45 = vector.broadcast %44 : vector<16x1xf32> to vector<16x32xf32>
    %46 = arith.mulf %36, %45 : vector<16x32xf32>
    %47 = arith.truncf %46 : vector<16x32xf32> to vector<16x32xbf16>
    %c0_17 = arith.constant 0 : index
    %c0_18 = arith.constant 0 : index
    %c0_19 = arith.constant 0 : index
    %48 = vector.load %arg3[%c0_17, %c0_18, %c0_19] : memref<2x32x256xbf16, #tpu.memory_space<vmem>>, vector<1x32x256xbf16>
    %49 = vector.shape_cast %48 : vector<1x32x256xbf16> to vector<32x256xbf16>
    %cst_20 = arith.constant dense<0.000000e+00> : vector<16x256xf32>
    %50 = tpu.matmul %47, %49, %cst_20 {dimension_numbers = #tpu.dot_dimension_numbers<[1], [0], [0], [1], [0, 0, 1, 1], [], []>} : vector<16x32xbf16>, vector<32x256xbf16>, vector<16x256xf32> -> vector<16x256xf32>
    %51 = vector.extract_strided_slice %50 {offsets = [0, 0], sizes = [16, 128], strides = [1, 1]} : vector<16x256xf32> to vector<16x128xf32>
    %52 = arith.mulf %51, %3 : vector<16x128xf32>
    %53 = vector.extract_strided_slice %50 {offsets = [0, 128], sizes = [16, 128], strides = [1, 1]} : vector<16x256xf32> to vector<16x128xf32>
    %54 = arith.mulf %53, %5 : vector<16x128xf32>
    %55 = arith.addf %52, %54 : vector<16x128xf32>
    %56 = vector.extract_strided_slice %55 {offsets = [0, 64], sizes = [16, 16], strides = [1, 1]} : vector<16x128xf32> to vector<16x16xf32>
    %57 = vector.extract_strided_slice %55 {offsets = [0, 80], sizes = [16, 16], strides = [1, 1]} : vector<16x128xf32> to vector<16x16xf32>
    %58 = vector.extract_strided_slice %55 {offsets = [0, 0], sizes = [16, 16], strides = [1, 1]} : vector<16x128xf32> to vector<16x16xf32>
    %59 = vector.extract_strided_slice %55 {offsets = [0, 16], sizes = [16, 16], strides = [1, 1]} : vector<16x128xf32> to vector<16x16xf32>
    %60 = vector.extract_strided_slice %55 {offsets = [0, 32], sizes = [16, 16], strides = [1, 1]} : vector<16x128xf32> to vector<16x16xf32>
    %61 = vector.extract_strided_slice %55 {offsets = [0, 48], sizes = [16, 16], strides = [1, 1]} : vector<16x128xf32> to vector<16x16xf32>
    %62 = tpu.concatenate %58, %59, %60, %61 in 0 : vector<16x16xf32>, vector<16x16xf32>, vector<16x16xf32>, vector<16x16xf32> -> vector<64x16xf32>
    %63 = arith.truncf %62 : vector<64x16xf32> to vector<64x16xbf16>
    %64 = arith.truncf %56 : vector<16x16xf32> to vector<16x16xbf16>
    %cst_21 = arith.constant dense<0.000000e+00> : vector<64x16xf32>
    %65 = tpu.matmul %63, %64, %cst_21 {dimension_numbers = #tpu.dot_dimension_numbers<[1], [1], [0], [0], [0, 0, 1, 0], [], []>} : vector<64x16xbf16>, vector<16x16xbf16>, vector<64x16xf32> -> vector<64x16xf32>
    %cst_22 = arith.constant -1.000000e+30 : f32
    %66 = vector.broadcast %cst_22 : f32 to vector<64x16xf32>
    %67 = arith.select %32, %65, %66 : vector<64x16xi1>, vector<64x16xf32>
    %cst_23 = arith.constant dense<0xFF800000> : vector<64xf32>
    %68 = vector.multi_reduction <maximumf>, %67, %cst_23 [1] : vector<64x16xf32> to vector<64xf32>
    %69 = vector.shape_cast %68 : vector<64xf32> to vector<64x1xf32>
    %70 = vector.broadcast %69 : vector<64x1xf32> to vector<64x16xf32>
    %71 = arith.subf %67, %70 : vector<64x16xf32>
    %72 = math.exp %71 : vector<64x16xf32>
    %cst_24 = arith.constant dense<0.000000e+00> : vector<64xf32>
    %73 = vector.multi_reduction <add>, %72, %cst_24 [1] : vector<64x16xf32> to vector<64xf32>
    %74 = vector.shape_cast %73 : vector<64xf32> to vector<64x1xf32>
    %75 = tpu.reciprocal %74 {approx = true} : vector<64x1xf32> -> vector<64x1xf32>
    %76 = vector.broadcast %75 : vector<64x1xf32> to vector<64x16xf32>
    %77 = arith.mulf %72, %76 : vector<64x16xf32>
    %78 = arith.truncf %77 : vector<64x16xf32> to vector<64x16xbf16>
    %79 = arith.truncf %57 : vector<16x16xf32> to vector<16x16xbf16>
    %cst_25 = arith.constant dense<0.000000e+00> : vector<64x16xf32>
    %80 = tpu.matmul %78, %79, %cst_25 {dimension_numbers = #tpu.dot_dimension_numbers<[1], [0], [0], [1], [0, 0, 1, 1], [], []>} : vector<64x16xbf16>, vector<16x16xbf16>, vector<64x16xf32> -> vector<64x16xf32>
    %81 = vector.extract_strided_slice %80 {offsets = [0, 0], sizes = [16, 16], strides = [1, 1]} : vector<64x16xf32> to vector<16x16xf32>
    %82 = vector.extract_strided_slice %80 {offsets = [16, 0], sizes = [16, 16], strides = [1, 1]} : vector<64x16xf32> to vector<16x16xf32>
    %83 = vector.extract_strided_slice %80 {offsets = [32, 0], sizes = [16, 16], strides = [1, 1]} : vector<64x16xf32> to vector<16x16xf32>
    %84 = vector.extract_strided_slice %80 {offsets = [48, 0], sizes = [16, 16], strides = [1, 1]} : vector<64x16xf32> to vector<16x16xf32>
    %85 = tpu.concatenate %81, %82, %83, %84 in 1 : vector<16x16xf32>, vector<16x16xf32>, vector<16x16xf32>, vector<16x16xf32> -> vector<16x64xf32>
    %86 = arith.truncf %85 : vector<16x64xf32> to vector<16x64xbf16>
    %c0_26 = arith.constant 0 : index
    %c0_27 = arith.constant 0 : index
    %c0_28 = arith.constant 0 : index
    %87 = vector.load %arg4[%c0_26, %c0_27, %c0_28] : memref<2x64x32xbf16, #tpu.memory_space<vmem>>, vector<1x64x32xbf16>
    %88 = vector.shape_cast %87 : vector<1x64x32xbf16> to vector<64x32xbf16>
    %cst_29 = arith.constant dense<0.000000e+00> : vector<16x32xf32>
    %89 = tpu.matmul %86, %88, %cst_29 {dimension_numbers = #tpu.dot_dimension_numbers<[1], [0], [0], [1], [0, 0, 1, 1], [], []>} : vector<16x64xbf16>, vector<64x32xbf16>, vector<16x32xf32> -> vector<16x32xf32>
    %90 = arith.addf %89, %0 : vector<16x32xf32>
    %c1_i32_30 = arith.constant 1 : i32
    %91 = tpu.dynamic_rotate %90 by %c1_i32_30 dim 0 : vector<16x32xf32>, i32 -> vector<16x32xf32>
    %cst_31 = arith.constant 0.000000e+00 : f32
    %92 = vector.broadcast %cst_31 : f32 to vector<16x32xf32>
    %93 = arith.select %13, %91, %92 : vector<16x32xi1>, vector<16x32xf32>
    %94 = arith.select %11, %90, %93 : vector<16x32xi1>, vector<16x32xf32>
    %95 = arith.mulf %94, %94 : vector<16x32xf32>
    %cst_32 = arith.constant dense<0.000000e+00> : vector<16xf32>
    %96 = vector.multi_reduction <add>, %95, %cst_32 [1] : vector<16x32xf32> to vector<16xf32>
    %97 = vector.shape_cast %96 : vector<16xf32> to vector<16x1xf32>
    %cst_33 = arith.constant 1.000000e-24 : f32
    %98 = vector.broadcast %cst_33 : f32 to vector<16x1xf32>
    %99 = arith.maximumf %97, %98 : vector<16x1xf32>
    %100 = math.rsqrt %99 : vector<16x1xf32>
    %cst_34 = arith.constant 5.65685415 : f32
    %101 = vector.broadcast %cst_34 : f32 to vector<16x1xf32>
    %102 = arith.mulf %100, %101 : vector<16x1xf32>
    %103 = vector.broadcast %102 : vector<16x1xf32> to vector<16x32xf32>
    %104 = arith.mulf %94, %103 : vector<16x32xf32>
    %105 = arith.truncf %104 : vector<16x32xf32> to vector<16x32xbf16>
    %c0_35 = arith.constant 0 : index
    %c0_36 = arith.constant 0 : index
    %c0_37 = arith.constant 0 : index
    %106 = vector.load %arg5[%c0_35, %c0_36, %c0_37] : memref<2x32x128xbf16, #tpu.memory_space<vmem>>, vector<1x32x128xbf16>
    %107 = vector.shape_cast %106 : vector<1x32x128xbf16> to vector<32x128xbf16>
    %cst_38 = arith.constant dense<0.000000e+00> : vector<16x128xf32>
    %108 = tpu.matmul %105, %107, %cst_38 {dimension_numbers = #tpu.dot_dimension_numbers<[1], [0], [0], [1], [0, 0, 1, 1], [], []>} : vector<16x32xbf16>, vector<32x128xbf16>, vector<16x128xf32> -> vector<16x128xf32>
    %109 = vector.extract_strided_slice %6 {offsets = [0, 0], sizes = [1, 128], strides = [1, 1]} : vector<2x128xf32> to vector<1x128xf32>
    %110 = vector.broadcast %109 : vector<1x128xf32> to vector<16x128xf32>
    %111 = arith.addf %108, %110 : vector<16x128xf32>
    %cst_39 = arith.constant 5.000000e-01 : f32
    %112 = vector.broadcast %cst_39 : f32 to vector<16x128xf32>
    %113 = arith.mulf %112, %111 : vector<16x128xf32>
    %cst_40 = arith.constant 4.471500e-02 : f32
    %114 = vector.broadcast %cst_40 : f32 to vector<16x128xf32>
    %115 = arith.mulf %114, %111 : vector<16x128xf32>
    %116 = arith.mulf %115, %111 : vector<16x128xf32>
    %117 = arith.mulf %116, %111 : vector<16x128xf32>
    %118 = arith.addf %111, %117 : vector<16x128xf32>
    %cst_41 = arith.constant 0.797884583 : f32
    %119 = vector.broadcast %cst_41 : f32 to vector<16x128xf32>
    %120 = arith.mulf %119, %118 : vector<16x128xf32>
    %121 = math.tanh %120 : vector<16x128xf32>
    %cst_42 = arith.constant 1.000000e+00 : f32
    %122 = vector.broadcast %cst_42 : f32 to vector<16x128xf32>
    %123 = arith.addf %122, %121 : vector<16x128xf32>
    %124 = arith.mulf %113, %123 : vector<16x128xf32>
    %125 = arith.truncf %124 : vector<16x128xf32> to vector<16x128xbf16>
    %c0_43 = arith.constant 0 : index
    %c0_44 = arith.constant 0 : index
    %c0_45 = arith.constant 0 : index
    %126 = vector.load %arg7[%c0_43, %c0_44, %c0_45] : memref<2x128x32xbf16, #tpu.memory_space<vmem>>, vector<1x128x32xbf16>
    %127 = vector.shape_cast %126 : vector<1x128x32xbf16> to vector<128x32xbf16>
    %cst_46 = arith.constant dense<0.000000e+00> : vector<16x32xf32>
    %128 = tpu.matmul %125, %127, %cst_46 {dimension_numbers = #tpu.dot_dimension_numbers<[1], [0], [0], [1], [0, 0, 1, 1], [], []>} : vector<16x128xbf16>, vector<128x32xbf16>, vector<16x32xf32> -> vector<16x32xf32>
    %129 = vector.extract_strided_slice %7 {offsets = [0, 0], sizes = [1, 32], strides = [1, 1]} : vector<3x32xf32> to vector<1x32xf32>
    %130 = vector.broadcast %129 : vector<1x32xf32> to vector<16x32xf32>
    %131 = arith.addf %128, %130 : vector<16x32xf32>
    %132 = arith.addf %131, %90 : vector<16x32xf32>
    %c1_i32_47 = arith.constant 1 : i32
    %133 = tpu.dynamic_rotate %132 by %c1_i32_47 dim 0 : vector<16x32xf32>, i32 -> vector<16x32xf32>
    %cst_48 = arith.constant 0.000000e+00 : f32
    %134 = vector.broadcast %cst_48 : f32 to vector<16x32xf32>
    %135 = arith.select %13, %133, %134 : vector<16x32xi1>, vector<16x32xf32>
    %136 = arith.select %11, %132, %135 : vector<16x32xi1>, vector<16x32xf32>
    %137 = arith.mulf %136, %136 : vector<16x32xf32>
    %cst_49 = arith.constant dense<0.000000e+00> : vector<16xf32>
    %138 = vector.multi_reduction <add>, %137, %cst_49 [1] : vector<16x32xf32> to vector<16xf32>
    %139 = vector.shape_cast %138 : vector<16xf32> to vector<16x1xf32>
    %cst_50 = arith.constant 1.000000e-24 : f32
    %140 = vector.broadcast %cst_50 : f32 to vector<16x1xf32>
    %141 = arith.maximumf %139, %140 : vector<16x1xf32>
    %142 = math.rsqrt %141 : vector<16x1xf32>
    %cst_51 = arith.constant 5.65685415 : f32
    %143 = vector.broadcast %cst_51 : f32 to vector<16x1xf32>
    %144 = arith.mulf %142, %143 : vector<16x1xf32>
    %145 = vector.broadcast %144 : vector<16x1xf32> to vector<16x32xf32>
    %146 = arith.mulf %136, %145 : vector<16x32xf32>
    %147 = arith.truncf %146 : vector<16x32xf32> to vector<16x32xbf16>
    %c1 = arith.constant 1 : index
    %c0_52 = arith.constant 0 : index
    %c0_53 = arith.constant 0 : index
    %148 = vector.load %arg3[%c1, %c0_52, %c0_53] : memref<2x32x256xbf16, #tpu.memory_space<vmem>>, vector<1x32x256xbf16>
    %149 = vector.shape_cast %148 : vector<1x32x256xbf16> to vector<32x256xbf16>
    %cst_54 = arith.constant dense<0.000000e+00> : vector<16x256xf32>
    %150 = tpu.matmul %147, %149, %cst_54 {dimension_numbers = #tpu.dot_dimension_numbers<[1], [0], [0], [1], [0, 0, 1, 1], [], []>} : vector<16x32xbf16>, vector<32x256xbf16>, vector<16x256xf32> -> vector<16x256xf32>
    %151 = vector.extract_strided_slice %150 {offsets = [0, 0], sizes = [16, 128], strides = [1, 1]} : vector<16x256xf32> to vector<16x128xf32>
    %152 = arith.mulf %151, %3 : vector<16x128xf32>
    %153 = vector.extract_strided_slice %150 {offsets = [0, 128], sizes = [16, 128], strides = [1, 1]} : vector<16x256xf32> to vector<16x128xf32>
    %154 = arith.mulf %153, %5 : vector<16x128xf32>
    %155 = arith.addf %152, %154 : vector<16x128xf32>
    %156 = vector.extract_strided_slice %155 {offsets = [0, 64], sizes = [16, 16], strides = [1, 1]} : vector<16x128xf32> to vector<16x16xf32>
    %157 = vector.extract_strided_slice %155 {offsets = [0, 80], sizes = [16, 16], strides = [1, 1]} : vector<16x128xf32> to vector<16x16xf32>
    %158 = vector.extract_strided_slice %155 {offsets = [0, 0], sizes = [16, 16], strides = [1, 1]} : vector<16x128xf32> to vector<16x16xf32>
    %159 = vector.extract_strided_slice %155 {offsets = [0, 16], sizes = [16, 16], strides = [1, 1]} : vector<16x128xf32> to vector<16x16xf32>
    %160 = vector.extract_strided_slice %155 {offsets = [0, 32], sizes = [16, 16], strides = [1, 1]} : vector<16x128xf32> to vector<16x16xf32>
    %161 = vector.extract_strided_slice %155 {offsets = [0, 48], sizes = [16, 16], strides = [1, 1]} : vector<16x128xf32> to vector<16x16xf32>
    %162 = tpu.concatenate %158, %159, %160, %161 in 0 : vector<16x16xf32>, vector<16x16xf32>, vector<16x16xf32>, vector<16x16xf32> -> vector<64x16xf32>
    %163 = arith.truncf %162 : vector<64x16xf32> to vector<64x16xbf16>
    %164 = arith.truncf %156 : vector<16x16xf32> to vector<16x16xbf16>
    %cst_55 = arith.constant dense<0.000000e+00> : vector<64x16xf32>
    %165 = tpu.matmul %163, %164, %cst_55 {dimension_numbers = #tpu.dot_dimension_numbers<[1], [1], [0], [0], [0, 0, 1, 0], [], []>} : vector<64x16xbf16>, vector<16x16xbf16>, vector<64x16xf32> -> vector<64x16xf32>
    %cst_56 = arith.constant -1.000000e+30 : f32
    %166 = vector.broadcast %cst_56 : f32 to vector<64x16xf32>
    %167 = arith.select %32, %165, %166 : vector<64x16xi1>, vector<64x16xf32>
    %cst_57 = arith.constant dense<0xFF800000> : vector<64xf32>
    %168 = vector.multi_reduction <maximumf>, %167, %cst_57 [1] : vector<64x16xf32> to vector<64xf32>
    %169 = vector.shape_cast %168 : vector<64xf32> to vector<64x1xf32>
    %170 = vector.broadcast %169 : vector<64x1xf32> to vector<64x16xf32>
    %171 = arith.subf %167, %170 : vector<64x16xf32>
    %172 = math.exp %171 : vector<64x16xf32>
    %cst_58 = arith.constant dense<0.000000e+00> : vector<64xf32>
    %173 = vector.multi_reduction <add>, %172, %cst_58 [1] : vector<64x16xf32> to vector<64xf32>
    %174 = vector.shape_cast %173 : vector<64xf32> to vector<64x1xf32>
    %175 = tpu.reciprocal %174 {approx = true} : vector<64x1xf32> -> vector<64x1xf32>
    %176 = vector.broadcast %175 : vector<64x1xf32> to vector<64x16xf32>
    %177 = arith.mulf %172, %176 : vector<64x16xf32>
    %178 = arith.truncf %177 : vector<64x16xf32> to vector<64x16xbf16>
    %179 = arith.truncf %157 : vector<16x16xf32> to vector<16x16xbf16>
    %cst_59 = arith.constant dense<0.000000e+00> : vector<64x16xf32>
    %180 = tpu.matmul %178, %179, %cst_59 {dimension_numbers = #tpu.dot_dimension_numbers<[1], [0], [0], [1], [0, 0, 1, 1], [], []>} : vector<64x16xbf16>, vector<16x16xbf16>, vector<64x16xf32> -> vector<64x16xf32>
    %181 = vector.extract_strided_slice %180 {offsets = [0, 0], sizes = [16, 16], strides = [1, 1]} : vector<64x16xf32> to vector<16x16xf32>
    %182 = vector.extract_strided_slice %180 {offsets = [16, 0], sizes = [16, 16], strides = [1, 1]} : vector<64x16xf32> to vector<16x16xf32>
    %183 = vector.extract_strided_slice %180 {offsets = [32, 0], sizes = [16, 16], strides = [1, 1]} : vector<64x16xf32> to vector<16x16xf32>
    %184 = vector.extract_strided_slice %180 {offsets = [48, 0], sizes = [16, 16], strides = [1, 1]} : vector<64x16xf32> to vector<16x16xf32>
    %185 = tpu.concatenate %181, %182, %183, %184 in 1 : vector<16x16xf32>, vector<16x16xf32>, vector<16x16xf32>, vector<16x16xf32> -> vector<16x64xf32>
    %186 = arith.truncf %185 : vector<16x64xf32> to vector<16x64xbf16>
    %c1_60 = arith.constant 1 : index
    %c0_61 = arith.constant 0 : index
    %c0_62 = arith.constant 0 : index
    %187 = vector.load %arg4[%c1_60, %c0_61, %c0_62] : memref<2x64x32xbf16, #tpu.memory_space<vmem>>, vector<1x64x32xbf16>
    %188 = vector.shape_cast %187 : vector<1x64x32xbf16> to vector<64x32xbf16>
    %cst_63 = arith.constant dense<0.000000e+00> : vector<16x32xf32>
    %189 = tpu.matmul %186, %188, %cst_63 {dimension_numbers = #tpu.dot_dimension_numbers<[1], [0], [0], [1], [0, 0, 1, 1], [], []>} : vector<16x64xbf16>, vector<64x32xbf16>, vector<16x32xf32> -> vector<16x32xf32>
    %190 = arith.addf %189, %132 : vector<16x32xf32>
    %c1_i32_64 = arith.constant 1 : i32
    %191 = tpu.dynamic_rotate %190 by %c1_i32_64 dim 0 : vector<16x32xf32>, i32 -> vector<16x32xf32>
    %cst_65 = arith.constant 0.000000e+00 : f32
    %192 = vector.broadcast %cst_65 : f32 to vector<16x32xf32>
    %193 = arith.select %13, %191, %192 : vector<16x32xi1>, vector<16x32xf32>
    %194 = arith.select %11, %190, %193 : vector<16x32xi1>, vector<16x32xf32>
    %195 = arith.mulf %194, %194 : vector<16x32xf32>
    %cst_66 = arith.constant dense<0.000000e+00> : vector<16xf32>
    %196 = vector.multi_reduction <add>, %195, %cst_66 [1] : vector<16x32xf32> to vector<16xf32>
    %197 = vector.shape_cast %196 : vector<16xf32> to vector<16x1xf32>
    %cst_67 = arith.constant 1.000000e-24 : f32
    %198 = vector.broadcast %cst_67 : f32 to vector<16x1xf32>
    %199 = arith.maximumf %197, %198 : vector<16x1xf32>
    %200 = math.rsqrt %199 : vector<16x1xf32>
    %cst_68 = arith.constant 5.65685415 : f32
    %201 = vector.broadcast %cst_68 : f32 to vector<16x1xf32>
    %202 = arith.mulf %200, %201 : vector<16x1xf32>
    %203 = vector.broadcast %202 : vector<16x1xf32> to vector<16x32xf32>
    %204 = arith.mulf %194, %203 : vector<16x32xf32>
    %205 = arith.truncf %204 : vector<16x32xf32> to vector<16x32xbf16>
    %c1_69 = arith.constant 1 : index
    %c0_70 = arith.constant 0 : index
    %c0_71 = arith.constant 0 : index
    %206 = vector.load %arg5[%c1_69, %c0_70, %c0_71] : memref<2x32x128xbf16, #tpu.memory_space<vmem>>, vector<1x32x128xbf16>
    %207 = vector.shape_cast %206 : vector<1x32x128xbf16> to vector<32x128xbf16>
    %cst_72 = arith.constant dense<0.000000e+00> : vector<16x128xf32>
    %208 = tpu.matmul %205, %207, %cst_72 {dimension_numbers = #tpu.dot_dimension_numbers<[1], [0], [0], [1], [0, 0, 1, 1], [], []>} : vector<16x32xbf16>, vector<32x128xbf16>, vector<16x128xf32> -> vector<16x128xf32>
    %209 = vector.extract_strided_slice %6 {offsets = [1, 0], sizes = [1, 128], strides = [1, 1]} : vector<2x128xf32> to vector<1x128xf32>
    %210 = vector.broadcast %209 : vector<1x128xf32> to vector<16x128xf32>
    %211 = arith.addf %208, %210 : vector<16x128xf32>
    %cst_73 = arith.constant 5.000000e-01 : f32
    %212 = vector.broadcast %cst_73 : f32 to vector<16x128xf32>
    %213 = arith.mulf %212, %211 : vector<16x128xf32>
    %cst_74 = arith.constant 4.471500e-02 : f32
    %214 = vector.broadcast %cst_74 : f32 to vector<16x128xf32>
    %215 = arith.mulf %214, %211 : vector<16x128xf32>
    %216 = arith.mulf %215, %211 : vector<16x128xf32>
    %217 = arith.mulf %216, %211 : vector<16x128xf32>
    %218 = arith.addf %211, %217 : vector<16x128xf32>
    %cst_75 = arith.constant 0.797884583 : f32
    %219 = vector.broadcast %cst_75 : f32 to vector<16x128xf32>
    %220 = arith.mulf %219, %218 : vector<16x128xf32>
    %221 = math.tanh %220 : vector<16x128xf32>
    %cst_76 = arith.constant 1.000000e+00 : f32
    %222 = vector.broadcast %cst_76 : f32 to vector<16x128xf32>
    %223 = arith.addf %222, %221 : vector<16x128xf32>
    %224 = arith.mulf %213, %223 : vector<16x128xf32>
    %225 = arith.truncf %224 : vector<16x128xf32> to vector<16x128xbf16>
    %c1_77 = arith.constant 1 : index
    %c0_78 = arith.constant 0 : index
    %c0_79 = arith.constant 0 : index
    %226 = vector.load %arg7[%c1_77, %c0_78, %c0_79] : memref<2x128x32xbf16, #tpu.memory_space<vmem>>, vector<1x128x32xbf16>
    %227 = vector.shape_cast %226 : vector<1x128x32xbf16> to vector<128x32xbf16>
    %cst_80 = arith.constant dense<0.000000e+00> : vector<16x32xf32>
    %228 = tpu.matmul %225, %227, %cst_80 {dimension_numbers = #tpu.dot_dimension_numbers<[1], [0], [0], [1], [0, 0, 1, 1], [], []>} : vector<16x128xbf16>, vector<128x32xbf16>, vector<16x32xf32> -> vector<16x32xf32>
    %229 = vector.extract_strided_slice %7 {offsets = [1, 0], sizes = [1, 32], strides = [1, 1]} : vector<3x32xf32> to vector<1x32xf32>
    %230 = vector.broadcast %229 : vector<1x32xf32> to vector<16x32xf32>
    %231 = arith.addf %228, %230 : vector<16x32xf32>
    %232 = arith.addf %231, %190 : vector<16x32xf32>
    %233 = arith.mulf %232, %232 : vector<16x32xf32>
    %cst_81 = arith.constant dense<0.000000e+00> : vector<16xf32>
    %234 = vector.multi_reduction <add>, %233, %cst_81 [1] : vector<16x32xf32> to vector<16xf32>
    %235 = vector.shape_cast %234 : vector<16xf32> to vector<16x1xf32>
    %cst_82 = arith.constant 1.000000e-24 : f32
    %236 = vector.broadcast %cst_82 : f32 to vector<16x1xf32>
    %237 = arith.maximumf %235, %236 : vector<16x1xf32>
    %238 = math.rsqrt %237 : vector<16x1xf32>
    %cst_83 = arith.constant 5.65685415 : f32
    %239 = vector.broadcast %cst_83 : f32 to vector<16x1xf32>
    %240 = arith.mulf %238, %239 : vector<16x1xf32>
    %241 = vector.broadcast %240 : vector<16x1xf32> to vector<16x32xf32>
    %242 = arith.mulf %232, %241 : vector<16x32xf32>
    %243 = vector.extract_strided_slice %7 {offsets = [2, 0], sizes = [1, 32], strides = [1, 1]} : vector<3x32xf32> to vector<1x32xf32>
    %244 = vector.broadcast %243 : vector<1x32xf32> to vector<16x32xf32>
    %245 = arith.mulf %242, %244 : vector<16x32xf32>
    %c0_84 = arith.constant 0 : index
    %c0_85 = arith.constant 0 : index
    %246 = vector.load %arg9[%c0_84, %c0_85] : memref<16x32xf32, #tpu.memory_space<vmem>>, vector<16x32xf32>
    tpu.vector_store %arg9[%c0_84, %c0_85], %245 {strides = array<i32>} : memref<16x32xf32, #tpu.memory_space<vmem>>, vector<16x32xf32>,
    return
  }
  func.func @transform_0(%arg0: i32) -> (i32, i32) {
    %c0_i32 = arith.constant 0 : i32
    %c0_i32_0 = arith.constant 0 : i32
    return %arg0, %c0_i32 : i32, i32
  }
  func.func @transform_1(%arg0: i32) -> (i32, i32, i32) {
    %c0_i32 = arith.constant 0 : i32
    %c0_i32_0 = arith.constant 0 : i32
    %c0_i32_1 = arith.constant 0 : i32
    %c0_i32_2 = arith.constant 0 : i32
    return %c0_i32, %c0_i32_0, %c0_i32_1 : i32, i32, i32
  }
  func.func @transform_2(%arg0: i32) -> (i32, i32, i32) {
    %c0_i32 = arith.constant 0 : i32
    %c0_i32_0 = arith.constant 0 : i32
    %c0_i32_1 = arith.constant 0 : i32
    %c0_i32_2 = arith.constant 0 : i32
    return %c0_i32, %c0_i32_0, %c0_i32_1 : i32, i32, i32
  }
  func.func @transform_3(%arg0: i32) -> (i32, i32, i32) {
    %c0_i32 = arith.constant 0 : i32
    %c0_i32_0 = arith.constant 0 : i32
    %c0_i32_1 = arith.constant 0 : i32
    %c0_i32_2 = arith.constant 0 : i32
    return %c0_i32, %c0_i32_0, %c0_i32_1 : i32, i32, i32
  }
  func.func @transform_4(%arg0: i32) -> (i32, i32, i32) {
    %c0_i32 = arith.constant 0 : i32
    %c0_i32_0 = arith.constant 0 : i32
    %c0_i32_1 = arith.constant 0 : i32
    %c0_i32_2 = arith.constant 0 : i32
    return %c0_i32, %c0_i32_0, %c0_i32_1 : i32, i32, i32
  }
  func.func @transform_5(%arg0: i32) -> (i32, i32) {
    %c0_i32 = arith.constant 0 : i32
    %c0_i32_0 = arith.constant 0 : i32
    %c0_i32_1 = arith.constant 0 : i32
    return %c0_i32, %c0_i32_0 : i32, i32
  }
  func.func @transform_6(%arg0: i32) -> (i32, i32, i32) {
    %c0_i32 = arith.constant 0 : i32
    %c0_i32_0 = arith.constant 0 : i32
    %c0_i32_1 = arith.constant 0 : i32
    %c0_i32_2 = arith.constant 0 : i32
    return %c0_i32, %c0_i32_0, %c0_i32_1 : i32, i32, i32
  }
  func.func @transform_7(%arg0: i32) -> (i32, i32) {
    %c0_i32 = arith.constant 0 : i32
    %c0_i32_0 = arith.constant 0 : i32
    %c0_i32_1 = arith.constant 0 : i32
    return %c0_i32, %c0_i32_0 : i32, i32
  }
  func.func @transform_8(%arg0: i32) -> (i32, i32) {
    %c0_i32 = arith.constant 0 : i32
    %c0_i32_0 = arith.constant 0 : i32
    return %arg0, %c0_i32 : i32, i32
  }
}

</mosaic_0001>

<bundles_post_ra>
// kernel: tpu_custom_call.1
= control target key start
LH: loop header
LB: loop body
LE: loop exit
PB: predicated region body
PF: predicated region fallthrough
CT: control target
= control target key end

     0   :  { %13 = vsyncpa [#allocation3], 0  ;;  %s2815_s0 = inlined_call_operand.vmem [shape: f32[32,32], index: 0, kind: input, shape index: {}]   ;;  %s2816_s1 = inlined_call_operand.vmem [shape: f32[2,16,128], index: 1, kind: input, shape index: {}]   ;;  %s2817_s2 = inlined_call_operand.vmem [shape: bf16[2,32,256], index: 2, kind: input, shape index: {}]   ;;  %s2818_s3 = inlined_call_operand.vmem [shape: bf16[2,64,32], index: 3, kind: input, shape index: {}]   ;;  %s2819_s4 = inlined_call_operand.vmem [shape: bf16[2,32,128], index: 4, kind: input, shape index: {}]   ;;  %s2820_s5 = inlined_call_operand.vmem [shape: f32[2,128], index: 5, kind: input, shape index: {}]   ;;  %s2821_s6 = inlined_call_operand.vmem [shape: bf16[2,128,32], index: 6, kind: input, shape index: {}]   ;;  %s2822_s7 = inlined_call_operand.vmem [shape: f32[3,32], index: 7, kind: input, shape index: {}]   ;;  %s2823_s8 = inlined_call_operand.hbm [shape: f32[32,32], index: 8, kind: output, shape index: {}]  }
   0x1   :  { %15 = vsyncpa [#allocation3 + $0x1], 0  ;;  %s2280_s27 = smov 0   ;;  %s2282_s28 = smov 0  }
   0x2   :  { %s2284_s29 = smov 0   ;;  %s2286_s30 = smov 0  }
   0x3 LB: > { %s2301_s9 = sadd.s32 4294967295, %s2224_s30   ;;  %s1712_s10 = sadd.s32 4294967294, %s2224_s30   ;;  %s2224_s30 = sphi %s2286_s30, %s2894_s30   ;;  %s2220_s29 = sphi %s2284_s29, %s2893_s29   ;;  %s2216_s28 = sphi %s2282_s28, %s2892_s28   ;;  %s2212_s27 = sphi %s2280_s27, %s2891_s27  }
   0x4   : > { %s2305_s11 = sadd.s32 1, %s2224_s30   ;;  %s201_s12 = sadd.s32 1, %s2220_s29 }
   0x5   : > { %s198_s13 = ssub.s32 %s2224_s30, %s2305_s11  ;;  %p211_p0 = scmp.ne.s32.totalorder %s2220_s29, %s2216_s28 }
   0x6   : > { %p199_p1 = scmp.eq.s32.totalorder %s198_s13, 0  ;;  %p212_p2 = scmp.eq.s32.totalorder %s2301_s9, 1 }
   0x7   : > { %p217_p3 = scmp.ne.s32.totalorder %s2216_s28, %s2212_s27  ;;  %p218_p4 = scmp.eq.s32.totalorder %s1712_s10, 1 }
   0x8   : > { %s2316_s14 = scalar_select %p199_p1, %s2220_s29, %s201_s12  }
   0x9   : > { %p2318_p5 = por %p212_p2, %p211_p0  ;;  %p2322_p6 = por %p218_p4, %p217_p3 }
   0xa   : > { %p1715_p7 = scmp.ge.s32.totalorder %s2224_s30, 1  ;;  %p266_p8 = scmp.lt.s32.totalorder %s2224_s30, 3 }
   0xc   : > { %p267_p9 = pnand %p1715_p7, %p266_p8 }
   0xd   : > { %s1717_s17 = sshll.u32 (!%p267_p9), %s2301_s9, 1  ;;  %s2226_s20 = smov (!%p267_p9), 96  }
   0xe   : > { %270 = sbr.rel (%p267_p9) target bundleno = 3596 (0xe0c), region = 52  ;;  %p301_p10 = scmp.lt.s32.totalorder (!%p267_p9), %s1717_s17, 3 }
   0xf   : > { %s2833_s22 = smov (!%p267_p9), 80   ;;  %s2229_s23 = smov (!%p267_p9), 112  }
  0x10   : > { %s2831_s24 = smov (!%p267_p9), 48   ;;  %s2825_s25 = smov (!%p267_p9), 16  }
  0x11   : > { %s2824_s26 = smov (!%p267_p9), 32   ;;  %s2855_s10 = smov (!%p267_p9), 80  }
  0x13   : > { %v316_v0 = vlaneseq  ;;  %s2896_s17 = smov (!%p301_p10, %s1717_s17), 3  ;;  %vm445_vm3 = vcmask 261120   ;;  %v1729_v16 = vld [vmem:[%s2817_s2 + $0x10] sm:$0xf]  ;;  %v1927_v17 = vld [vmem:[%s2817_s2 + $0x14] sm:$0xf0] }
  0x14   : > { %s1718_s18 = sshll.u32 %s2896_s17, 3  ;;  %v1926_v18 = vld [vmem:[%s2817_s2 + $0x14] sm:$0xf]  ;;  %v1730_v19 = vor.u32 %v1927_v17, %v1729_v16  ;;  %v1731_v20 = vld [vmem:[%s2817_s2 + $0x18] sm:$0xf0]  ;;  %v2388_v53 = vld [vmem:[%s2816_s1] sm:$0xff] }
  0x15   : > { %v2329_v1 = vshrl.u32 %v316_v0, 7  ;;  %v2331_v2 = vand.u32 127, %v316_v0  ;;  %s304_s21 = scalar_lea.vmem %s2815_s0, %s1718_s18  ;;  %v1721_v21 = vld [vmem:[%s2817_s2] sm:$0xf]  ;;  %v1925_v22 = vld [vmem:[%s2817_s2 + $0x4] sm:$0xf0]  ;;  %v1734_v23 = vor.u32 %v1926_v18, %v1731_v20 }
  0x16   : > { %v2336_v3 = vld [vmem:[%s304_s21] sm:$0xff]  ;;  %v2338_v4 = vld [vmem:[%s304_s21 + $0x8] sm:$0xff]  ;;  %512 = vmatpush.bf16.msra.mxu0 %v1730_v19  ;;  %v1722_v26 = vor.u32 %v1925_v22, %v1721_v21  ;;  %v2393_v54 = vld [vmem:[%s2816_s1 + $0x10] sm:$0xff]  ;;  %s2227_s21 = smov 64   ;;  %vm2828_vm10 = vcmask 130048   ;;  %s1960_s17 = sshll.u32 %s2301_s9, 4 }
  0x17   : > { %vm436_vm0 = vcmp.lt.s32.totalorder %v2329_v1, 1  ;;  %vm2830_vm1 = vcmp.gt.s32.totalorder %v2329_v1, 0  ;;  %v434_v5 = vrot.slane %v2336_v3, 7  ;;  %v435_v6 = vrot.slane %v2338_v4, 7  ;;  %v1924_v24 = vld [vmem:[%s2817_s2 + $0x4] sm:$0xf]  ;;  %526 = vmatpush.bf16.msra.mxu1 %v1734_v23 }
  0x18   : > { %vm2829_vm2 = vcmp.lt.s32.totalorder %v2331_v2, 16  ;;  %v1723_v25 = vld [vmem:[%s2817_s2 + $0x8] sm:$0xf0]  ;;  %v2403_v56 = vld [vmem:[%s2816_s1 + $0x18] sm:$0xff]  ;;  %v324_v22 = vadd.s32 16, %v2329_v1 }
  0x19   : > { %v438_v7 = vsel %vm436_vm0, %v435_v6, %v434_v5  ;;  %v437_v9 = vsel %vm436_vm0, %v434_v5, %v435_v6  ;;  %v1726_v27 = vor.u32 %v1924_v24, %v1723_v25  ;;  %v2398_v55 = vld [vmem:[%s2816_s1 + $0x8] sm:$0xff] }
  0x1a   : > { %v439_v8 = vsel %vm2830_vm1, %v438_v7, 0.0  ;;  %v442_v12 = vsel %vm2829_vm2, %v2338_v4, %v437_v9  ;;  %513 = vmatpush.bf16.msra.mxu0 %v1722_v26  ;;  %v348_v24 = vand.u32 15, %v324_v22  ;;  %v325_v26 = vadd.s32 24, %v2329_v1 }
  0x1b   : > { %v441_v10 = vsel %vm2829_vm2, %v2336_v3, %v439_v8  ;;  %v444_v14 = vmul.f32 %v442_v12, %v442_v12  ;;  %527 = vmatpush.bf16.msra.mxu1 %v1726_v27 }
  0x1c   : > { %v443_v11 = vmul.f32 %v441_v10, %v441_v10  ;;  %vm2428_vm11 = vcmp.le.s32.totalorder %v2331_v2, %v348_v24 }
  0x1d   : > { %v449_v15 = vsel %vm445_vm3, %v444_v14, 0.0 }
  0x1e   : > { %v446_v13 = vsel %vm445_vm3, %v443_v11, 0.0 }
  0x1f   : > { %447 = vadd.xlane.f32.xlu0 %v446_v13 }
  0x27   : > { %450 = vadd.xlane.f32.xlu0 %v449_v15 }
  0x92   : > { %v448_v28 = vpop.xlane.xlu0 %447 }
  0x93   : > { %v452_v29 = vmax.f32 %v448_v28, 1e-24 }
  0x95   : > { %2070 = vrsqrt.f32 %v452_v29  ;;  %vm460_vm5 = vweird.f32 %v452_v29 }
  0x9a   : > { %v451_v30 = vpop.xlane.xlu0 %450 }
  0x9b   : > { %v2071_v31 = vpop.eup %2070  ;;  %v453_v32 = vmax.f32 %v451_v30, 1e-24  ;;  %v355_v30 = vand.u32 15, %v325_v26 }
  0x9c   : > { %v455_v33 = vmul.f32 %v2071_v31, %v452_v29  ;;  %vm461_vm4 = vweird.f32 %v2071_v31 }
  0x9d   : > { %2072 = vrsqrt.f32 %v453_v32  ;;  %vm462_vm6 = vmor %vm460_vm5, %vm461_vm4  ;;  %vm470_vm8 = vweird.f32 %v453_v32  ;;  %vm2437_vm12 = vcmp.le.s32.totalorder %v2331_v2, %v355_v30 }
  0x9e   : > { %v456_v34 = vmul.f32 %v2071_v31, %v455_v33 }
  0xa0   : > { %v457_v35 = vmul.f32 0.5, %v456_v34 }
  0xa2   : > { %v458_v36 = vsub.f32 1.5, %v457_v35 }
  0xa3   : > { %v2073_v37 = vpop.eup %2072 }
  0xa4   : > { %v465_v38 = vmul.f32 %v2073_v37, %v453_v32  ;;  %v459_v39 = vmul.f32 %v2071_v31, %v458_v36  ;;  %vm471_vm7 = vweird.f32 %v2073_v37  ;;  %v326_v32 = vadd.s32 32, %v2329_v1 }
  0xa5   : > { %vm472_vm9 = vmor %vm470_vm8, %vm471_vm7  ;;  %vm2827_vm7 = vcmask 392192   ;;  %vm2826_vm8 = vcmask 523264  }
  0xa6   : > { %v466_v40 = vmul.f32 %v2073_v37, %v465_v38  ;;  %v463_v43 = vsel %vm462_vm6, %v2071_v31, %v459_v39  ;;  %v362_v36 = vand.u32 15, %v326_v32  ;;  %v327_v38 = vadd.s32 40, %v2329_v1 }
  0xa7   : > { %v474_v45 = vmul.f32 5.656854, %v463_v43 }
  0xa8   : > { %v467_v41 = vmul.f32 0.5, %v466_v40  ;;  %vm2446_vm13 = vcmp.le.s32.totalorder %v2331_v2, %v362_v36 }
  0xa9   : > { %v476_v48 = vmul.f32 %v474_v45, %v441_v10 }
  0xaa   : > { %v468_v42 = vsub.f32 1.5, %v467_v41 }
  0xac   : > { %v469_v44 = vmul.f32 %v2073_v37, %v468_v42  ;;  %v369_v42 = vand.u32 15, %v327_v38 }
  0xae   : > { %v473_v46 = vsel %vm472_vm9, %v2073_v37, %v469_v44  ;;  %vm2455_vm14 = vcmp.le.s32.totalorder %v2331_v2, %v369_v42  ;;  %v328_v44 = vadd.s32 48, %v2329_v1 }
  0xaf   : > { %v475_v47 = vmul.f32 5.656854, %v473_v46 }
  0xb1   : > { %v477_v49 = vmul.f32 %v475_v47, %v442_v12 }
  0xb3   : > { %v478_v50 = vpack.c.bf16 %v477_v49, %v476_v48  ;;  %v376_v48 = vand.u32 15, %v328_v44 }
  0xb5   : > { %1735 = vmatmul.msk.bf16.vlgmr.msra.gmra.mxu0 %vm445_vm3, %v478_v50  ;;  %1736 = vmatmul.msk.bf16.vlgmr.msra.gmra.mxu1 %vm445_vm3, %v478_v50  ;;  %vm2464_vm15 = vcmp.le.s32.totalorder %v2331_v2, %v376_v48  ;;  %v329_v50 = vadd.s32 56, %v2329_v1 }
 0x132   : > { %v515_v51 = vpop.f32.mrf.mxu0  ;;  %v529_v52 = vpop.f32.mrf.mxu1 }
 0x133   : > { %v534_v57 = vmul.f32 %v515_v51, %v2388_v53  ;;  %v536_v58 = vmul.f32 %v529_v52, %v2393_v54 }
 0x135   : > { %v538_v63 = vadd.f32 %v536_v58, %v534_v57  ;;  %v383_v58 = vand.u32 15, %v329_v50 }
 0x137   : > { %vm2473_vm4 = vcmp.le.s32.totalorder %v2331_v2, %v383_v58 }
 0x13a   : > { %v517_v59 = vpop.f32.mrf.mxu0  ;;  %v531_v60 = vpop.f32.mrf.mxu1 }
 0x13b   : > { %v535_v61 = vmul.f32 %v517_v59, %v2398_v55  ;;  %v537_v62 = vmul.f32 %v531_v60, %v2403_v56 }
 0x13d   : > { %v539_v0 = vadd.f32 %v537_v62, %v535_v61 }
 0x13f   : > { %v2015_v5 = vpack.i.bf16 %v539_v0, %v538_v63  ;;  %v2409_v6 = vpack.c.bf16 %v539_v0, %v538_v63 }
 0x141   : > { %2016 = vrot.lane.b32.xlu2 %v2015_v5, %s2226_s20  ;;  %565 = vrot.lane.b32.xlu1 %v2409_v6, %s2227_s21 }
 0x149   : > { %2021 = vrot.lane.b32.xlu2 %v2015_v5, %s2833_s22  ;;  %2011 = vrot.lane.b32.xlu1 %v2015_v5, %s2229_s23 }
 0x19b   : > { %v2017_v13 = vpop.permute.xlu2 %2016 }
 0x19c   : > { %v2019_v14 = vunpack.i.h.bf16 %v2017_v13  ;;  %v2018_v15 = vunpack.i.l.bf16 %v2017_v13 }
 0x19e   : > { %v562_v16 = vpack.c.bf16 %v2019_v14, %v2018_v15 }
 0x1a3   : > { %v2022_v17 = vpop.permute.xlu2 %2021 }
 0x1a4   : > { %v2024_v18 = vunpack.i.h.bf16 %v2022_v17  ;;  %v2023_v19 = vunpack.i.l.bf16 %v2022_v17 }
 0x1a6   : > { %v563_v20 = vpack.c.bf16 %v2024_v18, %v2023_v19  ;;  %v334_v19 = vand.u32 15, %v2329_v1 }
 0x1a8   : > { %vm2487_vm5 = vcmp.le.s32.totalorder %v2331_v2, %v334_v19 }
 0x1b3   : > { %v566_v7 = vpop.permute.xlu1 %565 }
 0x1b4   : > { %v581_v8 = vsel %vm2828_vm10, %v566_v7, 0 }
 0x1b5   : > { %590 = vmatpush.bf16.xpose.msra.mxu2 %v581_v8 }
 0x1bb   : > { %v2012_v9 = vpop.permute.xlu1 %2011 }
 0x1bc   : > { %1737 = vmatmul.msk.bf16.vlgmr.msra.gmra.mxu2 %vm2828_vm10, %v2409_v6  ;;  %v2014_v10 = vunpack.i.h.bf16 %v2012_v9  ;;  %v2013_v11 = vunpack.i.l.bf16 %v2012_v9 }
 0x1be   : > { %v561_v12 = vpack.c.bf16 %v2014_v10, %v2013_v11 }
 0x1cc   : > { %1738 = vmatmul.msk.bf16.gmra.mxu2 %vm2828_vm10, %v561_v12 }
 0x1dc   : > { %1739 = vmatmul.msk.bf16.gmra.mxu2 %vm2828_vm10, %v562_v16 }
 0x1ec   : > { %1740 = vmatmul.msk.bf16.gmra.mxu2 %vm2828_vm10, %v563_v20 }
 0x23f   : > { %v2422_v21 = vpop.f32.mrf.mxu2 }
 0x247   : > { %v2425_v23 = vpop.f32.mrf.mxu2 }
 0x24f   : > { %v597_v27 = vpop.f32.mrf.mxu2 }
 0x250   : > { %v614_v28 = vsel %vm2428_vm11, %v597_v27, -1e+30  ;;  %v320_v27 = vadd.s32 8, %v2329_v1 }
 0x251   : > { %v626_v29 = vsel %vm2828_vm10, %v614_v28, -inf }
 0x252   : > { %627 = vmax.xlane.f32.xlu0 %v626_v29  ;;  %v612_v29 = vsel %vm2487_vm5, %v2422_v21, -1e+30  ;;  %v341_v32 = vand.u32 15, %v320_v27 }
 0x254   : > { %vm2498_vm6 = vcmp.le.s32.totalorder %v2331_v2, %v341_v32 }
 0x255   : > { %v613_v21 = vsel %vm2498_vm6, %v2425_v23, -1e+30 }
 0x257   : > { %v599_v33 = vpop.f32.mrf.mxu2 }
 0x258   : > { %v615_v34 = vsel %vm2437_vm12, %v599_v33, -1e+30 }
 0x259   : > { %v629_v35 = vsel %vm2828_vm10, %v615_v34, -inf }
 0x25a   : > { %630 = vmax.xlane.f32.xlu1 %v629_v35  ;;  %v620_v35 = vsel %vm2828_vm10, %v612_v29, -inf }
 0x25f   : > { %v602_v39 = vpop.f32.mrf.mxu2 }
 0x260   : > { %v616_v40 = vsel %vm2446_vm13, %v602_v39, -1e+30 }
 0x261   : > { %v632_v41 = vsel %vm2828_vm10, %v616_v40, -inf }
 0x262   : > { %633 = vmax.xlane.f32.xlu2 %v632_v41 }
 0x267   : > { %v604_v45 = vpop.f32.mrf.mxu2 }
 0x268   : > { %v617_v46 = vsel %vm2455_vm14, %v604_v45, -1e+30  ;;  %v623_v45 = vsel %vm2828_vm10, %v613_v21, -inf }
 0x269   : > { %v635_v47 = vsel %vm2828_vm10, %v617_v46, -inf }
 0x26a   : > { %636 = vmax.xlane.f32.xlu0 %v635_v47 }
 0x26f   : > { %v607_v51 = vpop.f32.mrf.mxu2 }
 0x270   : > { %v618_v52 = vsel %vm2464_vm15, %v607_v51, -1e+30 }
 0x271   : > { %v638_v57 = vsel %vm2828_vm10, %v618_v52, -inf }
 0x272   : > { %639 = vmax.xlane.f32.xlu0 %v638_v57 }
 0x277   : > { %v609_v60 = vpop.f32.mrf.mxu2 }
 0x278   : > { %v619_v61 = vsel %vm2473_vm4, %v609_v60, -1e+30 }
 0x279   : > { %v641_v62 = vsel %vm2828_vm10, %v619_v61, -inf }
 0x27a   : > { %712 = vrot.lane.b32.xlu2 %v2409_v6, %s2831_s24  ;;  %642 = vmax.xlane.f32.xlu0 %v641_v62 }
 0x2c5   : > { %v628_v63 = vpop.xlane.xlu0 %627 }
 0x2c6   : > { %v646_v0 = vsub.f32 %v614_v28, %v628_v63 }
 0x2c8   : > { %v656_v5 = vmul.f32 1.442695, %v646_v0 }
 0x2ca   : > { %2074 = vpow2.f32 %v656_v5 }
 0x2cd   : > { %v631_v7 = vpop.xlane.xlu1 %630 }
 0x2ce   : > { %v647_v8 = vsub.f32 %v615_v34, %v631_v7 }
 0x2d0   : > { %v2075_v9 = vpop.eup %2074  ;;  %v658_v10 = vmul.f32 1.442695, %v647_v8 }
 0x2d1   : > { %v674_v11 = vsel %vm2828_vm10, %v2075_v9, 0.0 }
 0x2d2   : > { %2076 = vpow2.f32 %v658_v10  ;;  %675 = vadd.xlane.f32.xlu0 %v674_v11 }
 0x2d5   : > { %v634_v12 = vpop.xlane.xlu2 %633 }
 0x2d6   : > { %v648_v13 = vsub.f32 %v616_v40, %v634_v12 }
 0x2d8   : > { %v2077_v14 = vpop.eup %2076  ;;  %v660_v15 = vmul.f32 1.442695, %v648_v13 }
 0x2d9   : > { %v677_v16 = vsel %vm2828_vm10, %v2077_v14, 0.0 }
 0x2da   : > { %2078 = vpow2.f32 %v660_v15  ;;  %678 = vadd.xlane.f32.xlu0 %v677_v16 }
 0x2dd   : > { %v713_v6 = vpop.permute.xlu2 %712  ;;  %v637_v17 = vpop.xlane.xlu0 %636 }
 0x2de   : > { %v649_v18 = vsub.f32 %v617_v46, %v637_v17  ;;  %734 = vmatpush.bf16.msrb.mxu0 %v713_v6  ;;  %1961 = vmatpush.bf16.msra.mxu3 %v713_v6 }
 0x2e0   : > { %v2079_v20 = vpop.eup %2078  ;;  %v662_v22 = vmul.f32 1.442695, %v649_v18 }
 0x2e1   : > { %v680_v24 = vsel %vm2828_vm10, %v2079_v20, 0.0 }
 0x2e2   : > { %2080 = vpow2.f32 %v662_v22  ;;  %681 = vadd.xlane.f32.xlu1 %v680_v24 }
 0x2e5   : > { %v640_v28 = vpop.xlane.xlu0 %639 }
 0x2e6   : > { %v650_v30 = vsub.f32 %v618_v52, %v640_v28 }
 0x2e8   : > { %v2081_v33 = vpop.eup %2080  ;;  %v664_v34 = vmul.f32 1.442695, %v650_v30 }
 0x2e9   : > { %v683_v36 = vsel %vm2828_vm10, %v2081_v33, 0.0 }
 0x2ea   : > { %2082 = vpow2.f32 %v664_v34  ;;  %621 = vmax.xlane.f32.xlu1 %v620_v35  ;;  %684 = vadd.xlane.f32.xlu0 %v683_v36 }
 0x2ed   : > { %v643_v39 = vpop.xlane.xlu0 %642 }
 0x2ee   : > { %v651_v40 = vsub.f32 %v619_v61, %v643_v39 }
 0x2f0   : > { %v2083_v41 = vpop.eup %2082  ;;  %v666_v42 = vmul.f32 1.442695, %v651_v40 }
 0x2f1   : > { %v686_v44 = vsel %vm2828_vm10, %v2083_v41, 0.0 }
 0x2f2   : > { %2084 = vpow2.f32 %v666_v42  ;;  %687 = vadd.xlane.f32.xlu1 %v686_v44  ;;  %624 = vmax.xlane.f32.xlu0 %v623_v45 }
 0x2f8   : > { %v2085_v46 = vpop.eup %2084 }
 0x2f9   : > { %v689_v47 = vsel %vm2828_vm10, %v2085_v46, 0.0 }
 0x2fa   : > { %690 = vadd.xlane.f32.xlu0 %v689_v47  ;;  %v1931_v47 = vld [vmem:[%s2818_s3 + $0x18] sm:$0xff] }
 0x2fb   : > { %828 = vmatpush.bf16.msra.mxu0 %v1931_v47 }
 0x345   : > { %v676_v48 = vpop.xlane.xlu0 %675 }
 0x346   : > { %2086 = vrcp.f32 %v676_v48  ;;  %v1930_v48 = vld [vmem:[%s2818_s3 + $0x10] sm:$0xff] }
 0x347   : > { %829 = vmatpush.bf16.msra.mxu0 %v1930_v48 }
 0x34c   : > { %v2087_v51 = vpop.eup %2086 }
 0x34d   : > { %v679_v50 = vpop.xlane.xlu0 %678  ;;  %v702_v57 = vmul.f32 %v2087_v51, %v2075_v9  ;;  %v1928_v51 = vld [vmem:[%s2818_s3] sm:$0xff] }
 0x34e   : > { %2088 = vrcp.f32 %v679_v50  ;;  %v1929_v50 = vld [vmem:[%s2818_s3 + $0x8] sm:$0xff] }
 0x34f   : > { %830 = vmatpush.bf16.msra.mxu0 %v1929_v50 }
 0x353   : > { %831 = vmatpush.bf16.msra.mxu0 %v1928_v51 }
 0x354   : > { %v2089_v23 = vpop.eup %2088 }
 0x355   : > { %v682_v52 = vpop.xlane.xlu1 %681  ;;  %v703_v58 = vmul.f32 %v2089_v23, %v2077_v14 }
 0x356   : > { %2090 = vrcp.f32 %v682_v52 }
 0x357   : > { %v709_v60 = vpack.c.bf16 %v703_v58, %v702_v57 }
 0x359   : > { %1742 = vmatmul.msk.bf16.vlgmr.msra.gmra.mxu3 %vm2828_vm10, %v709_v60 }
 0x35c   : > { %v2091_v5 = vpop.eup %2090 }
 0x35d   : > { %v622_v61 = vpop.xlane.xlu1 %621  ;;  %v685_v62 = vpop.xlane.xlu0 %684  ;;  %v704_v10 = vmul.f32 %v2091_v5, %v2079_v20 }
 0x35e   : > { %v644_v63 = vsub.f32 %v612_v29, %v622_v61  ;;  %2092 = vrcp.f32 %v685_v62 }
 0x360   : > { %v652_v0 = vmul.f32 1.442695, %v644_v63 }
 0x362   : > { %2094 = vpow2.f32 %v652_v0 }
 0x364   : > { %v2093_v7 = vpop.eup %2092 }
 0x365   : > { %v625_v8 = vpop.xlane.xlu0 %624  ;;  %v705_v11 = vmul.f32 %v2093_v7, %v2081_v33  ;;  %v688_v14 = vpop.xlane.xlu1 %687 }
 0x366   : > { %v645_v12 = vsub.f32 %v613_v21, %v625_v8 }
 0x367   : > { %v710_v13 = vpack.c.bf16 %v705_v11, %v704_v10 }
 0x368   : > { %v2095_v15 = vpop.eup %2094  ;;  %v654_v9 = vmul.f32 1.442695, %v645_v12 }
 0x369   : > { %1743 = vmatmul.msk.bf16.gmra.mxu3 %vm2828_vm10, %v710_v13  ;;  %v668_v16 = vsel %vm2828_vm10, %v2095_v15, 0.0 }
 0x36a   : > { %2096 = vpow2.f32 %v654_v9  ;;  %669 = vadd.xlane.f32.xlu2 %v668_v16 }
 0x36b   : > { %2098 = vrcp.f32 %v688_v14 }
 0x36d   : > { %v691_v6 = vpop.xlane.xlu0 %690 }
 0x36e   : > { %2100 = vrcp.f32 %v691_v6 }
 0x370   : > { %v2097_v17 = vpop.eup %2096 }
 0x371   : > { %v671_v18 = vsel %vm2828_vm10, %v2097_v17, 0.0  ;;  %v2099_v19 = vpop.eup %2098 }
 0x372   : > { %672 = vadd.xlane.f32.xlu1 %v671_v18  ;;  %v706_v22 = vmul.f32 %v2099_v19, %v2083_v41 }
 0x374   : > { %v2101_v20 = vpop.eup %2100 }
 0x375   : > { %v707_v24 = vmul.f32 %v2101_v20, %v2085_v46 }
 0x377   : > { %v711_v27 = vpack.c.bf16 %v707_v24, %v706_v22 }
 0x379   : > { %1744 = vmatmul.msk.bf16.gmra.mxu3 %vm2828_vm10, %v711_v27 }
 0x3dc   : > { %v741_v28 = vpop.f32.mrf.mxu3 }
 0x3dd   : > { %v670_v29 = vpop.xlane.xlu2 %669 }
 0x3de   : > { %2102 = vrcp.f32 %v670_v29 }
 0x3e4   : > { %v743_v30 = vpop.f32.mrf.mxu3  ;;  %v2103_v34 = vpop.eup %2102 }
 0x3e5   : > { %v2025_v32 = vpack.i.bf16 %v743_v30, %v741_v28  ;;  %v673_v33 = vpop.xlane.xlu1 %672  ;;  %v700_v39 = vmul.f32 %v2103_v34, %v2095_v15 }
 0x3e6   : > { %2104 = vrcp.f32 %v673_v33  ;;  %v1932_v33 = vld [vmem:[%s2819_s4] sm:$0xff] }
 0x3e7   : > { %2026 = vrot.lane.b32.xlu0 %v2025_v32, %s2825_s25  ;;  %v1933_v32 = vld [vmem:[%s2819_s4 + $0x8] sm:$0xff]  ;;  %s1646_s25 = scalar_lea.hbm %s2823_s8, %s1960_s17 }
 0x3e8   : > { %907 = vmatpush.bf16.msrb.mxu1 %v1933_v32 }
 0x3ec   : > { %v2105_v35 = vpop.eup %2104  ;;  %v746_v36 = vpop.f32.mrf.mxu3  ;;  %908 = vmatpush.bf16.msrb.mxu1 %v1932_v33 }
 0x3ed   : > { %v701_v21 = vmul.f32 %v2105_v35, %v2097_v17 }
 0x3ef   : > { %v708_v40 = vpack.c.bf16 %v701_v21, %v700_v39 }
 0x3f1   : > { %1741 = vmatmul.msk.bf16.vlgmr.msrb.gmra.mxu0 %vm2828_vm10, %v708_v40 }
 0x3f4   : > { %v748_v41 = vpop.f32.mrf.mxu3 }
 0x3f5   : > { %v2030_v42 = vpack.i.bf16 %v748_v41, %v746_v36 }
 0x3f7   : > { %2031 = vrot.lane.b32.xlu1 %v2030_v42, %s2824_s26 }
 0x3fc   : > { %v751_v44 = vpop.f32.mrf.mxu3 }
 0x404   : > { %v753_v45 = vpop.f32.mrf.mxu3 }
 0x405   : > { %v2035_v46 = vpack.i.bf16 %v753_v45, %v751_v44 }
 0x407   : > { %2036 = vrot.lane.b32.xlu0 %v2035_v46, %s2831_s24  ;;  %s297_s24 = sand.u32 1, %s2216_s28  }
 0x408   : > { %s1716_s13 = sshll.u32 %s297_s24, 4  ;;  %s1635_s9 = scalar_lea.sflag [#allocation3], %s297_s24 }
 0x409   : > { %s299_s26 = scalar_lea.vmem [#allocation2], %s1716_s13  ;;  %s2182_s13 = scalar_lea.hbm %s2823_s8, 32 }
 0x459   : > { %v2027_v52 = vpop.permute.xlu0 %2026 }
 0x45a   : > { %v2029_v57 = vunpack.i.h.bf16 %v2027_v52  ;;  %v2028_v58 = vunpack.i.l.bf16 %v2027_v52 }
 0x469   : > { %v2032_v60 = vpop.permute.xlu1 %2031 }
 0x46a   : > { %v2034_v0 = vunpack.i.h.bf16 %v2032_v60  ;;  %v2033_v5 = vunpack.i.l.bf16 %v2032_v60 }
 0x46e   : > { %v736_v23 = vpop.f32.mrf.mxu0 }
 0x46f   : > { %v780_v62 = vsel %vm2828_vm10, %v736_v23, %v2028_v58 }
 0x470   : > { %v782_v11 = vsel %vm445_vm3, %v780_v62, %v2033_v5  ;;  %v1940_v5 = vld [vmem:[%s2821_s6 + $0x30] sm:$0xff] }
 0x476   : > { %v738_v61 = vpop.f32.mrf.mxu0 }
 0x477   : > { %v781_v63 = vsel %vm2828_vm10, %v738_v61, %v2029_v57 }
 0x478   : > { %v783_v12 = vsel %vm445_vm3, %v781_v63, %v2034_v0  ;;  %v1941_v0 = vld [vmem:[%s2821_s6 + $0x38] sm:$0xff] }
 0x479   : > { %v2037_v7 = vpop.permute.xlu0 %2036  ;;  %999 = vmatpush.bf16.msrb.mxu2 %v1941_v0 }
 0x47a   : > { %v2039_v8 = vunpack.i.h.bf16 %v2037_v7  ;;  %v2038_v10 = vunpack.i.l.bf16 %v2037_v7  ;;  %v1939_v7 = vld [vmem:[%s2821_s6 + $0x28] sm:$0xff] }
 0x47c   : > { %v785_v13 = vsel %vm2827_vm7, %v782_v11, %v2038_v10  ;;  %v786_v15 = vsel %vm2827_vm7, %v783_v12, %v2039_v8  ;;  %v1938_v8 = vld [vmem:[%s2821_s6 + $0x20] sm:$0xff]  ;;  %v1937_v10 = vld [vmem:[%s2821_s6 + $0x18] sm:$0xff]  ;;  %v1936_v11 = vld [vmem:[%s2821_s6 + $0x10] sm:$0xff] }
 0x47d   : > { %v787_v9 = vpack.c.bf16 %v786_v15, %v785_v13  ;;  %1000 = vmatpush.bf16.msrb.mxu2 %v1940_v5  ;;  %v1935_v12 = vld [vmem:[%s2821_s6 + $0x8] sm:$0xff]  ;;  %v2589_v13 = vld [vmem:[%s2820_s5] sm:$0x3] }
 0x47e   : > { %v1934_v15 = vld [vmem:[%s2821_s6] sm:$0xff] }
 0x47f   : > { %1761 = vmatmul.msk.bf16.vlgmr.msra.gmra.mxu0 %vm2826_vm8, %v787_v9  ;;  %v885_v9 = vperm.slane %v2589_v13, 0 }
 0x481   : > { %1001 = vmatpush.bf16.msrb.mxu2 %v1939_v7  ;;  %v1817_v7 = vld [vmem:[%s2817_s2 + $0x30] sm:$0xf] }
 0x485   : > { %1002 = vmatpush.bf16.msrb.mxu2 %v1938_v8  ;;  %v1945_v8 = vld [vmem:[%s2817_s2 + $0x34] sm:$0xf0] }
 0x489   : > { %1003 = vmatpush.bf16.msrb.mxu2 %v1937_v10  ;;  %v1818_v10 = vor.u32 %v1945_v8, %v1817_v7 }
 0x48b   : > { %1092 = vmatpush.bf16.msra.mxu1 %v1818_v10 }
 0x48d   : > { %1004 = vmatpush.bf16.msrb.mxu2 %v1936_v11  ;;  %v1809_v11 = vld [vmem:[%s2817_s2 + $0x20] sm:$0xf] }
 0x491   : > { %1005 = vmatpush.bf16.msrb.mxu2 %v1935_v12  ;;  %v1943_v12 = vld [vmem:[%s2817_s2 + $0x24] sm:$0xf0] }
 0x495   : > { %1006 = vmatpush.bf16.msrb.mxu2 %v1934_v15  ;;  %v1810_v15 = vor.u32 %v1943_v12, %v1809_v11 }
 0x497   : > { %1093 = vmatpush.bf16.msra.mxu1 %v1810_v15 }
 0x4fc   : > { %v833_v14 = vpop.f32.mrf.mxu0 }
 0x4fd   : > { %v2537_v16 = vadd.f32 %v833_v14, %v2336_v3 }
 0x4ff   : > { %v838_v18 = vrot.slane %v2537_v16, 7 }
 0x504   : > { %v835_v6 = vpop.f32.mrf.mxu0 }
 0x505   : > { %v2540_v17 = vadd.f32 %v835_v6, %v2338_v4 }
 0x507   : > { %v839_v19 = vrot.slane %v2540_v17, 7 }
 0x509   : > { %v840_v20 = vsel %vm436_vm0, %v838_v18, %v839_v19  ;;  %v841_v22 = vsel %vm436_vm0, %v839_v19, %v838_v18 }
 0x50a   : > { %v845_v24 = vsel %vm2829_vm2, %v2540_v17, %v840_v20  ;;  %v842_v3 = vsel %vm2830_vm1, %v841_v22, 0.0 }
 0x50b   : > { %v847_v27 = vmul.f32 %v845_v24, %v845_v24  ;;  %v844_v4 = vsel %vm2829_vm2, %v2537_v16, %v842_v3 }
 0x50c   : > { %v846_v28 = vmul.f32 %v844_v4, %v844_v4 }
 0x50d   : > { %v851_v29 = vsel %vm445_vm3, %v847_v27, 0.0 }
 0x50e   : > { %852 = vadd.xlane.f32.xlu0 %v851_v29  ;;  %v848_v30 = vsel %vm445_vm3, %v846_v28, 0.0 }
 0x50f   : > { %849 = vadd.xlane.f32.xlu1 %v848_v30 }
 0x581   : > { %v853_v34 = vpop.xlane.xlu0 %852 }
 0x582   : > { %v855_v35 = vmax.f32 %v853_v34, 1e-24  ;;  %v850_v36 = vpop.xlane.xlu1 %849 }
 0x583   : > { %v854_v39 = vmax.f32 %v850_v36, 1e-24 }
 0x584   : > { %2106 = vrsqrt.f32 %v855_v35  ;;  %vm872_vm7 = vweird.f32 %v855_v35 }
 0x585   : > { %2108 = vrsqrt.f32 %v854_v39  ;;  %vm862_vm2 = vweird.f32 %v854_v39 }
 0x58a   : > { %v2107_v21 = vpop.eup %2106 }
 0x58b   : > { %v2109_v40 = vpop.eup %2108  ;;  %v867_v41 = vmul.f32 %v2107_v21, %v855_v35  ;;  %vm873_vm9 = vweird.f32 %v2107_v21 }
 0x58c   : > { %v857_v42 = vmul.f32 %v2109_v40, %v854_v39  ;;  %vm863_vm8 = vweird.f32 %v2109_v40  ;;  %vm874_vm10 = vmor %vm872_vm7, %vm873_vm9 }
 0x58d   : > { %v868_v44 = vmul.f32 %v2107_v21, %v867_v41  ;;  %vm864_vm1 = vmor %vm862_vm2, %vm863_vm8  ;;  %vm2853_vm2 = vcmp.lt.s32.totalorder %v2331_v2, 16 }
 0x58e   : > { %v858_v45 = vmul.f32 %v2109_v40, %v857_v42 }
 0x58f   : > { %v869_v46 = vmul.f32 0.5, %v868_v44  ;;  %v2598_v44 = vld [vmem:[%s2822_s7] sm:$0x7] }
 0x590   : > { %v859_v47 = vmul.f32 0.5, %v858_v45 }
 0x591   : > { %v870_v48 = vsub.f32 1.5, %v869_v46  ;;  %v950_v46 = vperm.slane %v2598_v44, 0 }
 0x592   : > { %v860_v50 = vsub.f32 1.5, %v859_v47 }
 0x593   : > { %v871_v51 = vmul.f32 %v2107_v21, %v870_v48 }
 0x594   : > { %v861_v23 = vmul.f32 %v2109_v40, %v860_v50 }
 0x595   : > { %v875_v52 = vsel %vm874_vm10, %v2107_v21, %v871_v51  ;;  %vm2854_vm10 = vmmov %vm2853_vm2 }
 0x596   : > { %v877_v57 = vmul.f32 5.656854, %v875_v52  ;;  %v865_v58 = vsel %vm864_vm1, %v2109_v40, %v861_v23  ;;  %vm2852_vm1 = vcmp.gt.s32.totalorder %v2329_v1, 0 }
 0x597   : > { %v876_v60 = vmul.f32 5.656854, %v865_v58 }
 0x598   : > { %v879_v61 = vmul.f32 %v877_v57, %v845_v24 }
 0x599   : > { %v878_v62 = vmul.f32 %v876_v60, %v844_v4 }
 0x59b   : > { %v880_v63 = vpack.c.bf16 %v879_v61, %v878_v62 }
 0x59d   : > { %1770 = vmatmul.msk.bf16.vlgmr.msrb.gmra.mxu1 %vm445_vm3, %v880_v63 }
 0x61a   : > { %v910_v14 = vpop.f32.mrf.mxu1 }
 0x61b   : > { %v911_v6 = vadd.f32 %v910_v14, %v885_v9 }
 0x61d   : > { %v917_v18 = vmul.f32 0.044715, %v911_v6  ;;  %v915_v36 = vmul.f32 0.5, %v911_v6 }
 0x61f   : > { %v919_v19 = vmul.f32 %v917_v18, %v911_v6  ;;  %v1819_v18 = vld [vmem:[%s2817_s2 + $0x38] sm:$0xf0] }
 0x621   : > { %v921_v20 = vmul.f32 %v919_v19, %v911_v6  ;;  %v1942_v19 = vld [vmem:[%s2817_s2 + $0x24] sm:$0xf] }
 0x622   : > { %v912_v22 = vpop.f32.mrf.mxu1 }
 0x623   : > { %v913_v24 = vadd.f32 %v912_v22, %v885_v9  ;;  %v923_v3 = vadd.f32 %v921_v20, %v911_v6  ;;  %v1944_v6 = vld [vmem:[%s2817_s2 + $0x34] sm:$0xf]  ;;  %v1811_v22 = vld [vmem:[%s2817_s2 + $0x28] sm:$0xf0] }
 0x624   : > { %v1822_v20 = vor.u32 %v1944_v6, %v1819_v18 }
 0x625   : > { %v918_v27 = vmul.f32 0.044715, %v913_v24  ;;  %v925_v28 = vmul.f32 0.7978846, %v923_v3  ;;  %v916_v39 = vmul.f32 0.5, %v913_v24 }
 0x626   : > { %1106 = vmatpush.bf16.msrb.mxu1 %v1822_v20 }
 0x627   : > { %v920_v4 = vmul.f32 %v918_v27, %v913_v24  ;;  %2110 = vtanh.f32 %v925_v28 }
 0x629   : > { %v922_v29 = vmul.f32 %v920_v4, %v913_v24 }
 0x62b   : > { %v924_v30 = vadd.f32 %v922_v29, %v913_v24  ;;  %v1814_v24 = vor.u32 %v1942_v19, %v1811_v22 }
 0x62d   : > { %v926_v32 = vmul.f32 0.7978846, %v924_v30  ;;  %v2111_v33 = vpop.eup %2110  ;;  %1107 = vmatpush.bf16.msrb.mxu1 %v1814_v24 }
 0x62e   : > { %v929_v34 = vadd.f32 1.0, %v2111_v33 }
 0x62f   : > { %2112 = vtanh.f32 %v926_v32 }
 0x630   : > { %v931_v40 = vmul.f32 %v929_v34, %v915_v36 }
 0x635   : > { %v2113_v35 = vpop.eup %2112 }
 0x636   : > { %v930_v21 = vadd.f32 1.0, %v2113_v35 }
 0x638   : > { %v932_v41 = vmul.f32 %v930_v21, %v916_v39 }
 0x63a   : > { %v933_v42 = vpack.c.bf16 %v932_v41, %v931_v40 }
 0x63c   : > { %1007 = vmatmul.bf16.vlgmr.msrb.gmra.mxu2 %v933_v42 }
 0x6bf   : > { %v1008_v45 = vpop.f32.mrf.mxu2 }
 0x6c0   : > { %v1009_v47 = vadd.f32 %v1008_v45, %v950_v46 }
 0x6c2   : > { %v2602_v50 = vadd.f32 %v1009_v47, %v2537_v16 }
 0x6c4   : > { %v1015_v52 = vrot.slane %v2602_v50, 7 }
 0x6c7   : > { %v1010_v48 = vpop.f32.mrf.mxu2 }
 0x6c8   : > { %v1011_v51 = vadd.f32 %v1010_v48, %v950_v46 }
 0x6ca   : > { %v2605_v23 = vadd.f32 %v1011_v51, %v2540_v17 }
 0x6cc   : > { %v1016_v57 = vrot.slane %v2605_v23, 7 }
 0x6ce   : > { %v1018_v58 = vsel %vm436_vm0, %v1016_v57, %v1015_v52  ;;  %v1017_v62 = vsel %vm436_vm0, %v1015_v52, %v1016_v57 }
 0x6cf   : > { %v1019_v60 = vsel %vm2852_vm1, %v1018_v58, 0.0  ;;  %v1022_v63 = vsel %vm2854_vm10, %v2605_v23, %v1017_v62 }
 0x6d0   : > { %v1021_v61 = vsel %vm2853_vm2, %v2602_v50, %v1019_v60  ;;  %v1024_v0 = vmul.f32 %v1022_v63, %v1022_v63 }
 0x6d1   : > { %v1023_v16 = vmul.f32 %v1021_v61, %v1021_v61 }
 0x6d2   : > { %v1028_v5 = vsel %vm445_vm3, %v1024_v0, 0.0 }
 0x6d3   : > { %v1025_v17 = vsel %vm445_vm3, %v1023_v16, 0.0 }
 0x6d4   : > { %1026 = vadd.xlane.f32.xlu2 %v1025_v17 }
 0x6dc   : > { %1029 = vadd.xlane.f32.xlu2 %v1028_v5 }
 0x747   : > { %v1027_v9 = vpop.xlane.xlu2 %1026 }
 0x748   : > { %v1031_v14 = vmax.f32 %v1027_v9, 1e-24 }
 0x74a   : > { %2114 = vrsqrt.f32 %v1031_v14  ;;  %vm1039_vm8 = vweird.f32 %v1031_v14 }
 0x74f   : > { %v1030_v3 = vpop.xlane.xlu2 %1029 }
 0x750   : > { %v2115_v27 = vpop.eup %2114  ;;  %v1032_v4 = vmax.f32 %v1030_v3, 1e-24 }
 0x751   : > { %v1034_v28 = vmul.f32 %v2115_v27, %v1031_v14  ;;  %vm1040_vm7 = vweird.f32 %v2115_v27 }
 0x752   : > { %2116 = vrsqrt.f32 %v1032_v4  ;;  %vm1041_vm9 = vmor %vm1039_vm8, %vm1040_vm7  ;;  %vm1049_vm2 = vweird.f32 %v1032_v4  ;;  %vm2856_vm7 = vcmask 130048  }
 0x753   : > { %v1035_v29 = vmul.f32 %v2115_v27, %v1034_v28  ;;  %vm2857_vm8 = vmmov %vm2856_vm7 }
 0x755   : > { %v1036_v30 = vmul.f32 0.5, %v1035_v29 }
 0x757   : > { %v1037_v32 = vsub.f32 1.5, %v1036_v30 }
 0x758   : > { %v2117_v33 = vpop.eup %2116 }
 0x759   : > { %v1044_v34 = vmul.f32 %v2117_v33, %v1032_v4  ;;  %v1038_v35 = vmul.f32 %v2115_v27, %v1037_v32  ;;  %vm1050_vm1 = vweird.f32 %v2117_v33 }
 0x75a   : > { %vm1051_vm10 = vmor %vm1049_vm2, %vm1050_vm1 }
 0x75b   : > { %v1045_v36 = vmul.f32 %v2117_v33, %v1044_v34  ;;  %v1042_v21 = vsel %vm1041_vm9, %v2115_v27, %v1038_v35  ;;  %vm2858_vm9 = vmmov %vm2856_vm7 }
 0x75c   : > { %v1053_v42 = vmul.f32 5.656854, %v1042_v21  ;;  %vm2859_vm1 = vmmov %vm2856_vm7 }
 0x75d   : > { %v1046_v39 = vmul.f32 0.5, %v1045_v36  ;;  %vm2860_vm2 = vmmov %vm2859_vm1 }
 0x75e   : > { %v1055_v47 = vmul.f32 %v1053_v42, %v1021_v61 }
 0x75f   : > { %v1047_v40 = vsub.f32 1.5, %v1046_v39 }
 0x761   : > { %v1048_v41 = vmul.f32 %v2117_v33, %v1047_v40 }
 0x763   : > { %v1052_v45 = vsel %vm1051_vm10, %v2117_v33, %v1048_v41  ;;  %vm2861_vm10 = vmmov %vm2859_vm1 }
 0x764   : > { %v1054_v46 = vmul.f32 5.656854, %v1052_v45 }
 0x766   : > { %v1056_v48 = vmul.f32 %v1054_v46, %v1022_v63 }
 0x768   : > { %v1057_v51 = vpack.c.bf16 %v1056_v48, %v1055_v47 }
 0x76a   : > { %1823 = vmatmul.msk.bf16.vlgmr.msra.gmra.mxu1 %vm445_vm3, %v1057_v51 }
 0x77a   : > { %1824 = vmatmul.msk.bf16.vlgmr.msrb.gmra.mxu1 %vm445_vm3, %v1057_v51 }
 0x7e7   : > { %v1095_v52 = vpop.f32.mrf.mxu1 }
 0x7e8   : > { %v1114_v62 = vmul.f32 %v1095_v52, %v2388_v53 }
 0x7ef   : > { %v1097_v57 = vpop.f32.mrf.mxu1 }
 0x7f0   : > { %v1115_v17 = vmul.f32 %v1097_v57, %v2398_v55 }
 0x7f7   : > { %v1109_v58 = vpop.f32.mrf.mxu1 }
 0x7f8   : > { %v1116_v60 = vmul.f32 %v1109_v58, %v2393_v54 }
 0x7fa   : > { %v1118_v5 = vadd.f32 %v1116_v60, %v1114_v62 }
 0x7ff   : > { %v1111_v16 = vpop.f32.mrf.mxu1 }
 0x800   : > { %v1117_v0 = vmul.f32 %v1111_v16, %v2403_v56 }
 0x802   : > { %v1119_v61 = vadd.f32 %v1117_v0, %v1115_v17 }
 0x804   : > { %v2045_v63 = vpack.i.bf16 %v1119_v61, %v1118_v5  ;;  %v1140_v7 = vpack.c.bf16 %v1119_v61, %v1118_v5 }
 0x806   : > { %2046 = vrot.lane.b32.xlu0 %v2045_v63, %s2226_s20  ;;  %2041 = vrot.lane.b32.xlu1 %v2045_v63, %s2229_s23  ;;  %s2869_s20 = smov 48   ;;  %s2882_s23 = smov 32  }
 0x807   : > { %1145 = vrot.lane.b32.xlu2 %v1140_v7, %s2227_s21  ;;  %s2881_s21 = smov 16  }
 0x80f   : > { %2051 = vrot.lane.b32.xlu2 %v2045_v63, %s2855_s10  ;;  %s1647_s10 = sshll.u32 %s299_s26, 4  ;;  %s1648_s10 = int_to_ptr.vmem [resolvable:$true] %s1647_s10 }
 0x861   : > { %v1146_v54 = vpop.permute.xlu2 %1145 }
 0x862   : > { %v1160_v8 = vsel %vm2856_vm7, %v1146_v54, 0  ;;  %vm2862_vm7 = vmmov %vm2859_vm1 }
 0x863   : > { %1169 = vmatpush.bf16.xpose.msrb.mxu3 %v1160_v8 }
 0x869   : > { %v2052_v14 = vpop.permute.xlu2 %2051 }
 0x86a   : > { %1825 = vmatmul.msk.bf16.vlgmr.msrb.gmra.mxu3 %vm2857_vm8, %v1140_v7  ;;  %v2054_v6 = vunpack.i.h.bf16 %v2052_v14  ;;  %v2053_v18 = vunpack.i.l.bf16 %v2052_v14  ;;  %vm2863_vm8 = vmmov %vm2859_vm1 }
 0x86c   : > { %v1143_v19 = vpack.c.bf16 %v2054_v6, %v2053_v18 }
 0x878   : > { %v2042_v53 = vpop.permute.xlu1 %2041  ;;  %v2047_v11 = vpop.permute.xlu0 %2046 }
 0x879   : > { %v2044_v55 = vunpack.i.h.bf16 %v2042_v53  ;;  %v2043_v56 = vunpack.i.l.bf16 %v2042_v53  ;;  %v2049_v12 = vunpack.i.h.bf16 %v2047_v11  ;;  %v2048_v15 = vunpack.i.l.bf16 %v2047_v11 }
 0x87b   : > { %v1141_v10 = vpack.c.bf16 %v2044_v55, %v2043_v56  ;;  %v1142_v9 = vpack.c.bf16 %v2049_v12, %v2048_v15 }
 0x87d   : > { %1826 = vmatmul.msk.bf16.gmra.mxu3 %vm2858_vm9, %v1141_v10  ;;  %vm2873_vm9 = vmmov %vm2859_vm1 }
 0x88d   : > { %1827 = vmatmul.msk.bf16.gmra.mxu3 %vm2859_vm1, %v1142_v9 }
 0x89d   : > { %1828 = vmatmul.msk.bf16.gmra.mxu3 %vm2860_vm2, %v1143_v19  ;;  %vm2874_vm2 = vmmov %vm2859_vm1 }
 0x8ed   : > { %v1171_v20 = vpop.f32.mrf.mxu3 }
 0x8ee   : > { %v1191_v22 = vsel %vm2487_vm5, %v1171_v20, -1e+30  ;;  %vm2864_vm5 = vmmov %vm2859_vm1 }
 0x8ef   : > { %v1199_v24 = vsel %vm2861_vm10, %v1191_v22, -inf  ;;  %vm2875_vm10 = vmmov %vm2859_vm1 }
 0x8f0   : > { %1200 = vmax.xlane.f32.xlu2 %v1199_v24 }
 0x8f5   : > { %v1173_v3 = vpop.f32.mrf.mxu3 }
 0x8f6   : > { %v1192_v27 = vsel %vm2498_vm6, %v1173_v3, -1e+30  ;;  %vm2865_vm6 = vmmov %vm2859_vm1 }
 0x8f7   : > { %v1202_v4 = vsel %vm2862_vm7, %v1192_v27, -inf  ;;  %vm2876_vm7 = vmmov %vm2859_vm1 }
 0x8f8   : > { %1203 = vmax.xlane.f32.xlu0 %v1202_v4 }
 0x900   : > { %v1176_v28 = vpop.f32.mrf.mxu3 }
 0x901   : > { %v1193_v29 = vsel %vm2428_vm11, %v1176_v28, -1e+30  ;;  %vm2866_vm11 = vmmov %vm2859_vm1 }
 0x902   : > { %v1205_v30 = vsel %vm2863_vm8, %v1193_v29, -inf  ;;  %vm2877_vm8 = vmmov %vm2859_vm1 }
 0x903   : > { %1206 = vmax.xlane.f32.xlu1 %v1205_v30 }
 0x908   : > { %v1178_v32 = vpop.f32.mrf.mxu3 }
 0x909   : > { %v1194_v26 = vsel %vm2437_vm12, %v1178_v32, -1e+30  ;;  %vm2867_vm12 = vmmov %vm2859_vm1 }
 0x90a   : > { %v1208_v33 = vsel %vm2864_vm5, %v1194_v26, -inf  ;;  %vm2878_vm5 = vmmov %vm2859_vm1 }
 0x90b   : > { %1209 = vmax.xlane.f32.xlu2 %v1208_v33 }
 0x910   : > { %v1181_v34 = vpop.f32.mrf.mxu3 }
 0x911   : > { %v1195_v38 = vsel %vm2446_vm13, %v1181_v34, -1e+30  ;;  %vm2868_vm13 = vmmov %vm2859_vm1 }
 0x912   : > { %v1211_v35 = vsel %vm2865_vm6, %v1195_v38, -inf  ;;  %vm2879_vm6 = vmmov %vm2859_vm1 }
 0x913   : > { %1212 = vmax.xlane.f32.xlu2 %v1211_v35 }
 0x918   : > { %v1183_v36 = vpop.f32.mrf.mxu3 }
 0x919   : > { %v1196_v25 = vsel %vm2455_vm14, %v1183_v36, -1e+30  ;;  %vm2870_vm14 = vmmov %vm2859_vm1 }
 0x91a   : > { %v1214_v39 = vsel %vm2866_vm11, %v1196_v25, -inf  ;;  %vm2880_vm11 = vmmov %vm2859_vm1 }
 0x91b   : > { %1215 = vmax.xlane.f32.xlu0 %v1214_v39 }
 0x920   : > { %v1186_v21 = vpop.f32.mrf.mxu3 }
 0x921   : > { %v1197_v31 = vsel %vm2464_vm15, %v1186_v21, -1e+30  ;;  %vm2871_vm15 = vmmov %vm2859_vm1 }
 0x922   : > { %v1217_v40 = vsel %vm2867_vm12, %v1197_v31, -inf  ;;  %vm2883_vm12 = vmmov %vm2859_vm1 }
 0x923   : > { %1218 = vmax.xlane.f32.xlu1 %v1217_v40 }
 0x928   : > { %v1188_v41 = vpop.f32.mrf.mxu3 }
 0x929   : > { %v1198_v37 = vsel %vm2473_vm4, %v1188_v41, -1e+30  ;;  %vm2872_vm4 = vmmov %vm2859_vm1 }
 0x92a   : > { %v1220_v42 = vsel %vm2868_vm13, %v1198_v37, -inf  ;;  %vm2884_vm13 = vmmov %vm2859_vm1 }
 0x92b   : > { %1221 = vmax.xlane.f32.xlu2 %v1220_v42 }
 0x943   : > { %1291 = vrot.lane.b32.xlu2 %v1140_v7, %s2869_s20 }
 0x963   : > { %v1201_v43 = vpop.xlane.xlu2 %1200 }
 0x964   : > { %v1223_v45 = vsub.f32 %v1191_v22, %v1201_v43 }
 0x966   : > { %v1231_v46 = vmul.f32 1.442695, %v1223_v45 }
 0x968   : > { %2118 = vpow2.f32 %v1231_v46 }
 0x96b   : > { %v1204_v47 = vpop.xlane.xlu0 %1203 }
 0x96c   : > { %v1224_v48 = vsub.f32 %v1192_v27, %v1204_v47 }
 0x96e   : > { %v2119_v49 = vpop.eup %2118  ;;  %v1233_v51 = vmul.f32 1.442695, %v1224_v48 }
 0x96f   : > { %v1247_v52 = vsel %vm2870_vm14, %v2119_v49, 0.0  ;;  %vm2885_vm14 = vcmask 392192  }
 0x970   : > { %2120 = vpow2.f32 %v1233_v51  ;;  %1248 = vadd.xlane.f32.xlu0 %v1247_v52 }
 0x976   : > { %v2121_v57 = vpop.eup %2120  ;;  %v1207_v59 = vpop.xlane.xlu1 %1206 }
 0x977   : > { %v1225_v58 = vsub.f32 %v1193_v29, %v1207_v59  ;;  %v1250_v60 = vsel %vm2871_vm15, %v2121_v57, 0.0  ;;  %vm2886_vm15 = vmmov %vm2885_vm14 }
 0x978   : > { %1251 = vadd.xlane.f32.xlu1 %v1250_v60 }
 0x979   : > { %v1235_v16 = vmul.f32 1.442695, %v1225_v58 }
 0x97b   : > { %2122 = vpow2.f32 %v1235_v16 }
 0x97e   : > { %v1210_v62 = vpop.xlane.xlu2 %1209 }
 0x97f   : > { %v1226_v17 = vsub.f32 %v1194_v26, %v1210_v62 }
 0x981   : > { %v2123_v0 = vpop.eup %2122  ;;  %v1237_v5 = vmul.f32 1.442695, %v1226_v17 }
 0x982   : > { %v1253_v61 = vsel %vm2872_vm4, %v2123_v0, 0.0  ;;  %vm2887_vm4 = vcmask 523264  }
 0x983   : > { %2124 = vpow2.f32 %v1237_v5  ;;  %1254 = vadd.xlane.f32.xlu0 %v1253_v61 }
 0x986   : > { %v1213_v63 = vpop.xlane.xlu2 %1212 }
 0x987   : > { %v1227_v7 = vsub.f32 %v1195_v38, %v1213_v63 }
 0x989   : > { %v2125_v54 = vpop.eup %2124  ;;  %v1239_v8 = vmul.f32 1.442695, %v1227_v7 }
 0x98a   : > { %v1256_v53 = vsel %vm2873_vm9, %v2125_v54, 0.0  ;;  %vm2888_vm9 = vcmp.lt.s32.totalorder %v2331_v2, 16 }
 0x98b   : > { %2126 = vpow2.f32 %v1239_v8  ;;  %1257 = vadd.xlane.f32.xlu1 %v1256_v53  ;;  %v1949_v53 = vld [vmem:[%s2818_s3 + $0x38] sm:$0xff] }
 0x98c   : > { %1406 = vmatpush.bf16.msra.mxu1 %v1949_v53  ;;  %v1957_v53 = vld [vmem:[%s2821_s6 + $0x68] sm:$0xff] }
 0x98e   : > { %v1216_v55 = vpop.xlane.xlu0 %1215 }
 0x98f   : > { %v1228_v56 = vsub.f32 %v1196_v25, %v1216_v55  ;;  %v1948_v55 = vld [vmem:[%s2818_s3 + $0x30] sm:$0xff] }
 0x990   : > { %1407 = vmatpush.bf16.msra.mxu1 %v1948_v55  ;;  %v1956_v55 = vld [vmem:[%s2821_s6 + $0x60] sm:$0xff] }
 0x991   : > { %v2127_v10 = vpop.eup %2126  ;;  %v1241_v11 = vmul.f32 1.442695, %v1228_v56  ;;  %v1947_v56 = vld [vmem:[%s2818_s3 + $0x28] sm:$0xff] }
 0x992   : > { %v1259_v12 = vsel %vm2859_vm1, %v2127_v10, 0.0  ;;  %vm2889_vm1 = vcmp.gt.s32.totalorder %v2329_v1, 0  ;;  %v1950_v1 = vld [vmem:[%s2819_s4 + $0x10] sm:$0xff] }
 0x993   : > { %2128 = vpow2.f32 %v1241_v11  ;;  %1260 = vadd.xlane.f32.xlu0 %v1259_v12 }
 0x994   : > { %1408 = vmatpush.bf16.msra.mxu1 %v1947_v56  ;;  %v1955_v56 = vld [vmem:[%s2821_s6 + $0x58] sm:$0xff] }
 0x996   : > { %v1219_v15 = vpop.xlane.xlu1 %1218 }
 0x997   : > { %v1229_v9 = vsub.f32 %v1197_v31, %v1219_v15 }
 0x999   : > { %v2129_v14 = vpop.eup %2128  ;;  %v1243_v6 = vmul.f32 1.442695, %v1229_v9 }
 0x99a   : > { %v1262_v18 = vsel %vm2874_vm2, %v2129_v14, 0.0  ;;  %vm2890_vm2 = vmmov %vm2888_vm9 }
 0x99b   : > { %2130 = vpow2.f32 %v1243_v6  ;;  %1263 = vadd.xlane.f32.xlu1 %v1262_v18 }
 0x99e   : > { %v1222_v19 = vpop.xlane.xlu2 %1221 }
 0x99f   : > { %v1230_v20 = vsub.f32 %v1198_v37, %v1222_v19 }
 0x9a1   : > { %v2131_v22 = vpop.eup %2130  ;;  %v1245_v24 = vmul.f32 1.442695, %v1230_v20 }
 0x9a2   : > { %v1265_v3 = vsel %vm2875_vm10, %v2131_v22, 0.0 }
 0x9a3   : > { %2132 = vpow2.f32 %v1245_v24  ;;  %1266 = vadd.xlane.f32.xlu0 %v1265_v3 }
 0x9a6   : > { %v1292_v27 = vpop.permute.xlu2 %1291 }
 0x9a7   : > { %1313 = vmatpush.bf16.msrb.mxu0 %v1292_v27 }
 0x9a9   : > { %v2133_v4 = vpop.eup %2132 }
 0x9aa   : > { %v1268_v28 = vsel %vm2876_vm7, %v2133_v4, 0.0 }
 0x9ab   : > { %1269 = vadd.xlane.f32.xlu1 %v1268_v28 }
 0x9e3   : > { %v1249_v29 = vpop.xlane.xlu0 %1248 }
 0x9e4   : > { %2134 = vrcp.f32 %v1249_v29 }
 0x9ea   : > { %v2135_v32 = vpop.eup %2134 }
 0x9eb   : > { %v1252_v30 = vpop.xlane.xlu1 %1251  ;;  %v1279_v33 = vmul.f32 %v2135_v32, %v2119_v49 }
 0x9ec   : > { %2136 = vrcp.f32 %v1252_v30 }
 0x9f2   : > { %v2137_v26 = vpop.eup %2136 }
 0x9f3   : > { %v1280_v34 = vmul.f32 %v2137_v26, %v2121_v57 }
 0x9f5   : > { %v1287_v38 = vpack.c.bf16 %v1280_v34, %v1279_v33 }
 0x9f6   : > { %v1255_v35 = vpop.xlane.xlu0 %1254 }
 0x9f7   : > { %1829 = vmatmul.msk.bf16.vlgmr.msrb.gmra.mxu0 %vm2877_vm8, %v1287_v38  ;;  %2138 = vrcp.f32 %v1255_v35 }
 0x9fd   : > { %v2139_v25 = vpop.eup %2138 }
 0x9fe   : > { %v1258_v36 = vpop.xlane.xlu1 %1257  ;;  %v1281_v21 = vmul.f32 %v2139_v25, %v2123_v0 }
 0x9ff   : > { %2140 = vrcp.f32 %v1258_v36 }
 0xa05   : > { %v2141_v39 = vpop.eup %2140 }
 0xa06   : > { %v1282_v31 = vmul.f32 %v2141_v39, %v2125_v54  ;;  %v1261_v41 = vpop.xlane.xlu0 %1260 }
 0xa07   : > { %2142 = vrcp.f32 %v1261_v41  ;;  %v1951_v41 = vld [vmem:[%s2819_s4 + $0x18] sm:$0xff] }
 0xa08   : > { %v1288_v40 = vpack.c.bf16 %v1282_v31, %v1281_v21  ;;  %1486 = vmatpush.bf16.msra.mxu2 %v1951_v41 }
 0xa0a   : > { %1830 = vmatmul.msk.bf16.gmra.mxu0 %vm2878_vm5, %v1288_v40 }
 0xa0c   : > { %1487 = vmatpush.bf16.msra.mxu2 %v1950_v1 }
 0xa0d   : > { %v2143_v42 = vpop.eup %2142 }
 0xa0e   : > { %v1264_v37 = vpop.xlane.xlu1 %1263  ;;  %v1283_v45 = vmul.f32 %v2143_v42, %v2127_v10  ;;  %v1946_v10 = vld [vmem:[%s2818_s3 + $0x20] sm:$0xff] }
 0xa0f   : > { %2144 = vrcp.f32 %v1264_v37  ;;  %1409 = vmatpush.bf16.msra.mxu1 %v1946_v10  ;;  %v1954_v10 = vld [vmem:[%s2821_s6 + $0x50] sm:$0xff] }
 0xa15   : > { %v2145_v43 = vpop.eup %2144 }
 0xa16   : > { %v1284_v46 = vmul.f32 %v2145_v43, %v2129_v14  ;;  %v1267_v48 = vpop.xlane.xlu0 %1266 }
 0xa17   : > { %2146 = vrcp.f32 %v1267_v48 }
 0xa18   : > { %v1289_v47 = vpack.c.bf16 %v1284_v46, %v1283_v45 }
 0xa1a   : > { %1831 = vmatmul.msk.bf16.gmra.mxu0 %vm2879_vm6, %v1289_v47 }
 0xa1d   : > { %v2147_v51 = vpop.eup %2146 }
 0xa1e   : > { %v1270_v49 = vpop.xlane.xlu1 %1269  ;;  %v1285_v57 = vmul.f32 %v2147_v51, %v2131_v22 }
 0xa1f   : > { %2148 = vrcp.f32 %v1270_v49 }
 0xa25   : > { %v2149_v52 = vpop.eup %2148 }
 0xa26   : > { %v1286_v59 = vmul.f32 %v2149_v52, %v2133_v4 }
 0xa28   : > { %v1290_v58 = vpack.c.bf16 %v1286_v59, %v1285_v57 }
 0xa2a   : > { %1832 = vmatmul.msk.bf16.gmra.mxu0 %vm2880_vm11, %v1290_v58 }
 0xa74   : > { %v1315_v60 = vpop.f32.mrf.mxu0 }
 0xa7c   : > { %v1317_v16 = vpop.f32.mrf.mxu0 }
 0xa87   : > { %v1320_v62 = vpop.f32.mrf.mxu0 }
 0xa8f   : > { %v1322_v17 = vpop.f32.mrf.mxu0 }
 0xa90   : > { %v2055_v0 = vpack.i.bf16 %v1322_v17, %v1320_v62 }
 0xa92   : > { %2056 = vrot.lane.b32.xlu2 %v2055_v0, %s2881_s21 }
 0xa97   : > { %v1325_v5 = vpop.f32.mrf.mxu0 }
 0xa9f   : > { %v1327_v61 = vpop.f32.mrf.mxu0 }
 0xaa0   : > { %v2060_v63 = vpack.i.bf16 %v1327_v61, %v1325_v5 }
 0xaa2   : > { %2061 = vrot.lane.b32.xlu0 %v2060_v63, %s2882_s23 }
 0xaa7   : > { %v1330_v7 = vpop.f32.mrf.mxu0 }
 0xaaf   : > { %v1332_v54 = vpop.f32.mrf.mxu0 }
 0xab0   : > { %v2065_v8 = vpack.i.bf16 %v1332_v54, %v1330_v7  ;;  %v1959_v54 = vld [vmem:[%s2821_s6 + $0x78] sm:$0xff] }
 0xab1   : > { %1579 = vmatpush.bf16.msrb.mxu1 %v1959_v54 }
 0xab2   : > { %2066 = vrot.lane.b32.xlu1 %v2065_v8, %s2869_s20  ;;  %v1958_v8 = vld [vmem:[%s2821_s6 + $0x70] sm:$0xff]  ;;  %s1649_s20 = sshll.u32 %s1646_s25, 4  ;;  %s1650_s20 = int_to_ptr.hbm [resolvable:$true] %s1649_s20 }
 0xab3   : > { %s2176_s21 = sshra.s32 %s1650_s20, 4  ;;  %s2177_s21 = int_to_ptr.hbm [resolvable:$true] %s2176_s21 }
 0xab4   : > { %s2178_s23 = scalar_lea.hbm %s2177_s21, 16  ;;  %p2183_p0 = scmp.lt.s32.totalorder %s2177_s21, %s2823_s8 }
 0xab5   : > { %1580 = vmatpush.bf16.msrb.mxu1 %v1958_v8  ;;  %p2179_p11 = scmp.ne.s32.totalorder %s2177_s21, %s2178_s23  ;;  %p2184_p1 = scmp.lt.s32.totalorder %s2182_s13, %s2178_s23 }
 0xab7   : > { %p2180_p12 = pnand %p2179_p11, %p2318_p5  ;;  %p2185_p2 = por %p2184_p1, %p2183_p0 }
 0xab9   : > { %1581 = vmatpush.bf16.msrb.mxu1 %v1957_v53  ;;  %p2181_p13 = pneg %p2180_p12 }
 0xabb   : > { %p2186_p3 = pnand %p2185_p2, %p2181_p13 }
 0xabd   : > { %1582 = vmatpush.bf16.msrb.mxu1 %v1956_v55 }
 0xac1   : > { %1583 = vmatpush.bf16.msrb.mxu1 %v1955_v56 }
 0xac5   : > { %1584 = vmatpush.bf16.msrb.mxu1 %v1954_v10 }
 0xaec   : > { %v2057_v11 = vpop.permute.xlu2 %2056 }
 0xaed   : > { %v2059_v15 = vunpack.i.h.bf16 %v2057_v11  ;;  %v2058_v9 = vunpack.i.l.bf16 %v2057_v11  ;;  %v1953_v11 = vld [vmem:[%s2821_s6 + $0x48] sm:$0xff] }
 0xaee   : > { %1585 = vmatpush.bf16.msrb.mxu1 %v1953_v11 }
 0xaef   : > { %v1360_v19 = vsel %vm2883_vm12, %v1317_v16, %v2059_v15  ;;  %v1359_v20 = vsel %vm2884_vm13, %v1315_v60, %v2058_v9  ;;  %v1464_v15 = vperm.slane %v2589_v13, 1 }
 0xb14   : > { %v2062_v12 = vpop.permute.xlu0 %2061 }
 0xb15   : > { %v2064_v14 = vunpack.i.h.bf16 %v2062_v12  ;;  %v2063_v6 = vunpack.i.l.bf16 %v2062_v12  ;;  %v1952_v12 = vld [vmem:[%s2821_s6 + $0x40] sm:$0xff] }
 0xb16   : > { %1586 = vmatpush.bf16.msrb.mxu1 %v1952_v12 }
 0xb17   : > { %v1362_v3 = vsel %vm445_vm3, %v1360_v19, %v2064_v14  ;;  %v1361_v27 = vsel %vm445_vm3, %v1359_v20, %v2063_v6 }
 0xb24   : > { %v2067_v18 = vpop.permute.xlu1 %2066 }
 0xb25   : > { %v2069_v22 = vunpack.i.h.bf16 %v2067_v18  ;;  %v2068_v24 = vunpack.i.l.bf16 %v2067_v18 }
 0xb27   : > { %v1364_v4 = vsel %vm2885_vm14, %v1362_v3, %v2069_v22  ;;  %v1363_v28 = vsel %vm2886_vm15, %v1361_v27, %v2068_v24 }
 0xb28   : > { %v1365_v29 = vpack.c.bf16 %v1364_v4, %v1363_v28 }
 0xb2a   : > { %1857 = vmatmul.msk.bf16.vlgmr.msra.gmra.mxu1 %vm2887_vm4, %v1365_v29 }
 0xba7   : > { %v1411_v30 = vpop.f32.mrf.mxu1 }
 0xba8   : > { %v2722_v32 = vadd.f32 %v1411_v30, %v2602_v50 }
 0xbaa   : > { %v1416_v34 = vrot.slane %v2722_v32, 7 }
 0xbaf   : > { %v1413_v26 = vpop.f32.mrf.mxu1 }
 0xbb0   : > { %v2725_v33 = vadd.f32 %v1413_v26, %v2605_v23 }
 0xbb2   : > { %v1417_v38 = vrot.slane %v2725_v33, 7 }
 0xbb4   : > { %v1418_v35 = vsel %vm436_vm0, %v1416_v34, %v1417_v38  ;;  %v1419_v36 = vsel %vm436_vm0, %v1417_v38, %v1416_v34 }
 0xbb5   : > { %v1423_v25 = vsel %vm2888_vm9, %v2725_v33, %v1418_v35  ;;  %v1420_v50 = vsel %vm2889_vm1, %v1419_v36, 0.0 }
 0xbb6   : > { %v1425_v39 = vmul.f32 %v1423_v25, %v1423_v25  ;;  %v1422_v23 = vsel %vm2890_vm2, %v2722_v32, %v1420_v50 }
 0xbb7   : > { %v1424_v21 = vmul.f32 %v1422_v23, %v1422_v23 }
 0xbb8   : > { %v1429_v31 = vsel %vm445_vm3, %v1425_v39, 0.0 }
 0xbb9   : > { %1430 = vadd.xlane.f32.xlu0 %v1429_v31  ;;  %v1426_v40 = vsel %vm445_vm3, %v1424_v21, 0.0 }
 0xbba   : > { %1427 = vadd.xlane.f32.xlu2 %v1426_v40 }
 0xc2c   : > { %v1431_v37 = vpop.xlane.xlu0 %1430 }
 0xc2d   : > { %v1433_v2 = vmax.f32 %v1431_v37, 1e-24  ;;  %v1428_v42 = vpop.xlane.xlu2 %1427 }
 0xc2e   : > { %v1432_v43 = vmax.f32 %v1428_v42, 1e-24 }
 0xc2f   : > { %2150 = vrsqrt.f32 %v1433_v2  ;;  %vm1450_vm7 = vweird.f32 %v1433_v2 }
 0xc30   : > { %2152 = vrsqrt.f32 %v1432_v43  ;;  %vm1440_vm5 = vweird.f32 %v1432_v43 }
 0xc35   : > { %v2151_v45 = vpop.eup %2150 }
 0xc36   : > { %v2153_v46 = vpop.eup %2152  ;;  %v1445_v47 = vmul.f32 %v2151_v45, %v1433_v2  ;;  %vm1451_vm0 = vweird.f32 %v2151_v45 }
 0xc37   : > { %v1435_v48 = vmul.f32 %v2153_v46, %v1432_v43  ;;  %vm1441_vm10 = vweird.f32 %v2153_v46  ;;  %vm1452_vm8 = vmor %vm1450_vm7, %vm1451_vm0 }
 0xc38   : > { %v1446_v49 = vmul.f32 %v2151_v45, %v1445_v47  ;;  %vm1442_vm6 = vmor %vm1440_vm5, %vm1441_vm10 }
 0xc39   : > { %v1436_v51 = vmul.f32 %v2153_v46, %v1435_v48 }
 0xc3a   : > { %v1447_v52 = vmul.f32 0.5, %v1446_v49 }
 0xc3b   : > { %v1437_v57 = vmul.f32 0.5, %v1436_v51 }
 0xc3c   : > { %v1448_v59 = vsub.f32 1.5, %v1447_v52 }
 0xc3d   : > { %v1438_v58 = vsub.f32 1.5, %v1437_v57 }
 0xc3e   : > { %v1449_v60 = vmul.f32 %v2151_v45, %v1448_v59 }
 0xc3f   : > { %v1439_v16 = vmul.f32 %v2153_v46, %v1438_v58 }
 0xc40   : > { %v1453_v62 = vsel %vm1452_vm8, %v2151_v45, %v1449_v60 }
 0xc41   : > { %v1455_v17 = vmul.f32 5.656854, %v1453_v62  ;;  %v1443_v0 = vsel %vm1442_vm6, %v2153_v46, %v1439_v16 }
 0xc42   : > { %v1454_v5 = vmul.f32 5.656854, %v1443_v0 }
 0xc43   : > { %v1457_v61 = vmul.f32 %v1455_v17, %v1423_v25  ;;  %v1629_v17 = vperm.slane %v2598_v44, 2 }
 0xc44   : > { %v1456_v63 = vmul.f32 %v1454_v5, %v1422_v23  ;;  %v1530_v23 = vperm.slane %v2598_v44, 1 }
 0xc46   : > { %v1458_v7 = vpack.c.bf16 %v1457_v61, %v1456_v63 }
 0xc48   : > { %1870 = vmatmul.msk.bf16.vlgmr.msra.gmra.mxu2 %vm445_vm3, %v1458_v7 }
 0xccb   : > { %v1489_v9 = vpop.f32.mrf.mxu2 }
 0xccc   : > { %v1490_v14 = vadd.f32 %v1489_v9, %v1464_v15 }
 0xcce   : > { %v1496_v6 = vmul.f32 0.044715, %v1490_v14  ;;  %v1494_v38 = vmul.f32 0.5, %v1490_v14 }
 0xcd0   : > { %v1498_v18 = vmul.f32 %v1496_v6, %v1490_v14 }
 0xcd2   : > { %v1500_v19 = vmul.f32 %v1498_v18, %v1490_v14 }
 0xcd3   : > { %v1491_v20 = vpop.f32.mrf.mxu2 }
 0xcd4   : > { %v1502_v22 = vadd.f32 %v1500_v19, %v1490_v14  ;;  %v1492_v24 = vadd.f32 %v1491_v20, %v1464_v15 }
 0xcd6   : > { %v1497_v3 = vmul.f32 0.044715, %v1492_v24  ;;  %v1504_v27 = vmul.f32 0.7978846, %v1502_v22  ;;  %v1495_v35 = vmul.f32 0.5, %v1492_v24 }
 0xcd8   : > { %v1499_v4 = vmul.f32 %v1497_v3, %v1492_v24  ;;  %2154 = vtanh.f32 %v1504_v27 }
 0xcda   : > { %v1501_v28 = vmul.f32 %v1499_v4, %v1492_v24 }
 0xcdc   : > { %v1503_v29 = vadd.f32 %v1501_v28, %v1492_v24 }
 0xcde   : > { %v1505_v30 = vmul.f32 0.7978846, %v1503_v29  ;;  %v2155_v26 = vpop.eup %2154 }
 0xcdf   : > { %v1508_v34 = vadd.f32 1.0, %v2155_v26 }
 0xce0   : > { %2156 = vtanh.f32 %v1505_v30 }
 0xce1   : > { %v1510_v25 = vmul.f32 %v1508_v34, %v1494_v38 }
 0xce6   : > { %v2157_v13 = vpop.eup %2156 }
 0xce7   : > { %v1509_v36 = vadd.f32 1.0, %v2157_v13 }
 0xce9   : > { %v1511_v50 = vmul.f32 %v1509_v36, %v1495_v35 }
 0xceb   : > { %v1512_v39 = vpack.c.bf16 %v1511_v50, %v1510_v25 }
 0xced   : > { %1587 = vmatmul.bf16.vlgmr.msrb.gmra.mxu1 %v1512_v39 }
 0xd6a   : > { %v1588_v21 = vpop.f32.mrf.mxu1 }
 0xd6b   : > { %v1589_v31 = vadd.f32 %v1588_v21, %v1530_v23 }
 0xd6d   : > { %v1593_v40 = vadd.f32 %v1589_v31, %v2722_v32 }
 0xd6f   : > { %v1595_v41 = vmul.f32 %v1593_v40, %v1593_v40 }
 0xd71   : > { %v1597_v1 = vsel %vm445_vm3, %v1595_v41, 0.0 }
 0xd72   : > { %v1590_v37 = vpop.f32.mrf.mxu1  ;;  %1598 = vadd.xlane.f32.xlu1 %v1597_v1 }
 0xd73   : > { %v1591_v2 = vadd.f32 %v1590_v37, %v1530_v23 }
 0xd75   : > { %v1594_v42 = vadd.f32 %v1591_v2, %v2725_v33 }
 0xd77   : > { %v1596_v43 = vmul.f32 %v1594_v42, %v1594_v42 }
 0xd79   : > { %v1600_v45 = vsel %vm445_vm3, %v1596_v43, 0.0 }
 0xd7a   : > { %1601 = vadd.xlane.f32.xlu2 %v1600_v45 }
 0xde5   : > { %v1599_v46 = vpop.xlane.xlu1 %1598 }
 0xde6   : > { %v1603_v47 = vmax.f32 %v1599_v46, 1e-24 }
 0xde8   : > { %2158 = vrsqrt.f32 %v1603_v47  ;;  %vm1611_vm12 = vweird.f32 %v1603_v47 }
 0xded   : > { %v1602_v48 = vpop.xlane.xlu2 %1601 }
 0xdee   : > { %v2159_v49 = vpop.eup %2158  ;;  %v1604_v51 = vmax.f32 %v1602_v48, 1e-24 }
 0xdef   : > { %v1606_v32 = vmul.f32 %v2159_v49, %v1603_v47  ;;  %vm1612_vm11 = vweird.f32 %v2159_v49 }
 0xdf0   : > { %2160 = vrsqrt.f32 %v1604_v51  ;;  %vm1613_vm13 = vmor %vm1611_vm12, %vm1612_vm11  ;;  %vm1621_vm15 = vweird.f32 %v1604_v51 }
 0xdf1   : > { %v1607_v52 = vmul.f32 %v2159_v49, %v1606_v32 }
 0xdf3   : > { %v1608_v57 = vmul.f32 0.5, %v1607_v52 }
 0xdf5   : > { %v1609_v59 = vsub.f32 1.5, %v1608_v57 }
 0xdf6   : > { %v2161_v58 = vpop.eup %2160 }
 0xdf7   : > { %v1610_v33 = vmul.f32 %v2159_v49, %v1609_v59  ;;  %v1616_v60 = vmul.f32 %v2161_v58, %v1604_v51  ;;  %vm1622_vm14 = vweird.f32 %v2161_v58 }
 0xdf8   : > { %vm1623_vm4 = vmor %vm1621_vm15, %vm1622_vm14 }
 0xdf9   : > { %v1614_v16 = vsel %vm1613_vm13, %v2159_v49, %v1610_v33  ;;  %v1617_v62 = vmul.f32 %v2161_v58, %v1616_v60 }
 0xdfa   : > { %v1625_v0 = vmul.f32 5.656854, %v1614_v16 }
 0xdfb   : > { %v1618_v5 = vmul.f32 0.5, %v1617_v62 }
 0xdfc   : > { %v1627_v61 = vmul.f32 %v1625_v0, %v1593_v40 }
 0xdfd   : > { %v1619_v63 = vsub.f32 1.5, %v1618_v5 }
 0xdfe   : > { %v1630_v7 = vmul.f32 %v1629_v17, %v1627_v61 }
 0xdff   : > { %v1620_v54 = vmul.f32 %v2161_v58, %v1619_v63 }
 0xe00   : > { %1632 = vst.msk [vmem:[%s299_s26] sm:$0xff] %vm445_vm3, %v1630_v7 }
 0xe01   : > { %v1624_v44 = vsel %vm1623_vm4, %v2161_v58, %v1620_v54 }
 0xe02   : > { %v1626_v8 = vmul.f32 5.656854, %v1624_v44 }
 0xe04   : > { %v1628_v53 = vmul.f32 %v1626_v8, %v1594_v42 }
 0xe06   : > { %v1631_v55 = vmul.f32 %v1629_v17, %v1628_v53 }
 0xe08   : > { %1633 = vst.msk [vmem:[%s299_s26 + $0x8] sm:$0xff] %vm445_vm3, %v1631_v55 }
 0xe09   : > { %2189 = shalt.err (!%p2186_p3)
}
 0xe0a   : > { %s2233_s24 = smov 128   ;;  %s2234_s19 = smov 8  }
 0xe0b   : > { %1962 = dma.vmem_to_hbm [thread:$0]  (%p2318_p5), %s1648_s10, 256, %s1650_s20, %s1635_s9, %s2233_s24, %s2233_s24, %s2234_s19  }
 0xe0c PF: > { %p1968_p4 = scmp.ge.s32.totalorder %s2224_s30, 2  ;;  %s1664_s25 = sand.u32 1, %s2212_s27  }
 0xe0d   : > { %s1665_s26 = scalar_lea.sflag [#allocation3], %s1664_s25 }
 0xe0e   : > { %p1965_p7 = pnand %p1968_p4, %p2322_p6 }
 0xe10   : > { %p1966_p8 = pneg %p1965_p7 }
 0xe12   : > { %2207 = dma.done.wait (%p1966_p8), %s1665_s26, 256  }
 0xe13   : > { %2209 = vsyncadd (%p1966_p8), %s1665_s26, 4294967040  ;;  %p18_p9 = scmp.ge.s32.totalorder %s2305_s11, 4   ;;  %s2891_s27 = smov %s2216_s28 }
 0xe14   : > { %s2892_s28 = smov %s2220_s29  ;;  %s2893_s29 = smov %s2316_s14 }
 0xe15   : > { %s2894_s30 = smov %s2305_s11  ;;  %20 = sbr.rel (!%p18_p9) target bundleno = 3 (0x3), region = 91 }
 0xe1a   :  { %1671 = vsyncpa [#allocation3], 1 }
 0xe1b   :  { %1673 = vsyncpa [#allocation3 + $0x1], 1 }

</bundles_post_ra>
